<compile_context>
chip_gen: v7x
topology: tpu7x:2x2x1
jax: 0.10.0
libtpu: 0.0.40
codegen_flags: <defaults>
</compile_context>

<pallas_src>
import functools
import math

import jax
import jax.numpy as jnp
from jax.experimental import pallas as pl
from jax.experimental.pallas import tpu as pltpu  # noqa: F401  (TPU backend assumed)

# ---------------------------------------------------------------------------
# model dimensions (scaled-down DistilBERT; real model: H=768, 12 heads, 6 layers)
# ---------------------------------------------------------------------------
VOCAB = 100
VOCAB_PAD = 128      # vocab table padded to 128 rows (lane-aligned one-hot matmul)
MAX_POS = 16
HIDDEN = 32          # stands in for BERT_OUTPUT = 768
N_HEADS = 2
HEAD_DIM = HIDDEN // N_HEADS
FFN_DIM = 64
N_LAYERS = 2
CLS_LAYERS = [24, 20]   # config['model']['layers']
MODEL_OUTPUT = 14
LN_EPS = 1e-12
NEG_INF = -1e9


def _full_spec(shape):
    """Whole-array BlockSpec (no grid)."""
    return pl.BlockSpec(shape, lambda: (0,) * len(shape))


# ---------------------------------------------------------------------------
# in-kernel helpers (operate on values, not refs)
# ---------------------------------------------------------------------------
def _layernorm(x, g, b):
    mu = jnp.mean(x, axis=-1, keepdims=True)
    xc = x - mu
    var = jnp.mean(xc * xc, axis=-1, keepdims=True)
    return xc * jax.lax.rsqrt(var + LN_EPS) * g + b


def _gelu(x):
    # TODO(synk): HF DistilBERT uses exact erf-GELU; tanh approximation used
    # here for Mosaic-safe lowering.
    return 0.5 * x * (1.0 + jnp.tanh(0.7978845608028654 * (x + 0.044715 * x * x * x)))


# ---------------------------------------------------------------------------
# the single fused kernel
# ---------------------------------------------------------------------------
def _fused_forward_kernel(B, S, *refs):
    o_ref = refs[-1]
    it = iter(refs[:-1])

    ids_ref = next(it)          # (B*S, 1) int32 token ids
    pos_ref = next(it)          # (B*S, 1) int32 position ids
    mask_ref = next(it)         # (B, S)   int32 attention mask (1 = keep)
    wemb_ref = next(it)         # (VOCAB_PAD, H)
    pemb_ref = next(it)         # (MAX_POS, H)
    emb_g = next(it)            # (1, H)
    emb_b = next(it)            # (1, H)

    layer_refs = []
    for _ in range(N_LAYERS):
        layer_refs.append([next(it) for _ in range(12)])

    head_refs = []
    for _ in range(len(CLS_LAYERS) + 1):
        head_refs.append((next(it), next(it)))

    f32 = jnp.float32
    BS = B * S

    # --- embeddings: in-VMEM gather via one-hot matmuls + fused LayerNorm ---
    ids = ids_ref[...]                                             # (BS, 1)
    pos = pos_ref[...]                                             # (BS, 1)
    word_oh = (jax.lax.broadcasted_iota(jnp.int32, (BS, VOCAB_PAD), 1) == ids).astype(f32)
    pos_oh = (jax.lax.broadcasted_iota(jnp.int32, (BS, MAX_POS), 1) == pos).astype(f32)
    x = (jnp.dot(word_oh, wemb_ref[...], preferred_element_type=f32)
         + jnp.dot(pos_oh, pemb_ref[...], preferred_element_type=f32))
    x = _layernorm(x, emb_g[...], emb_b[...])                      # (BS, H)

    # additive key mask, built once: (B, S), -1e9 where mask == 0
    add_mask = (1.0 - mask_ref[...].astype(f32)) * NEG_INF

    # --- transformer layers (fully unrolled at trace time) ---
    for (wqkv, bqkv, wo, bo, g1, b1, w1, bb1, w2, bb2, g2, b2) in layer_refs:
        # fused QKV projection (1/sqrt(Dh) already folded into the Q slice)
        qkv = jnp.dot(x, wqkv[...], preferred_element_type=f32) + bqkv[...]  # (BS, 3H)

        # per-(batch, head) attention with static sublane/lane slices — no transposes
        batch_ctx = []
        for b in range(B):
            row0 = b * S
            amask = add_mask[b:b + 1, :]                           # (1, S)
            head_ctx = []
            for h in range(N_HEADS):
                c0 = h * HEAD_DIM
                q = qkv[row0:row0 + S, c0:c0 + HEAD_DIM]                       # (S, Dh)
                k = qkv[row0:row0 + S, HIDDEN + c0:HIDDEN + c0 + HEAD_DIM]     # (S, Dh)
                v = qkv[row0:row0 + S, 2 * HIDDEN + c0:2 * HIDDEN + c0 + HEAD_DIM]
                s = jax.lax.dot_general(q, k, (((1,), (1,)), ((), ())),
                                        preferred_element_type=f32)           # (S, S)
                s = s + amask
                s = s - jnp.max(s, axis=-1, keepdims=True)
                p = jnp.exp(s)
                p = p * pl.reciprocal(jnp.sum(p, axis=-1, keepdims=True), approx=True)
                head_ctx.append(jnp.dot(p, v, preferred_element_type=f32))     # (S, Dh)
            batch_ctx.append(jnp.concatenate(head_ctx, axis=-1))               # (S, H)
        ctx = jnp.concatenate(batch_ctx, axis=0)                                # (BS, H)

        sa = jnp.dot(ctx, wo[...], preferred_element_type=f32) + bo[...]
        x = _layernorm(sa + x, g1[...], b1[...])

        h1 = _gelu(jnp.dot(x, w1[...], preferred_element_type=f32) + bb1[...])
        h2 = jnp.dot(h1, w2[...], preferred_element_type=f32) + bb2[...]
        x = _layernorm(h2 + x, g2[...], b2[...])

    # --- CLS pooling + classifier head (Dropout == identity in eval) ---
    h = jnp.concatenate([x[b * S:b * S + 1, :] for b in range(B)], axis=0)      # (B, H)
    for (w, b) in head_refs[:-1]:
        h = jnp.maximum(jnp.dot(h, w[...], preferred_element_type=f32) + b[...], 0.0)
    w, b = head_refs[-1]
    y = jnp.dot(h, w[...], preferred_element_type=f32) + b[...]                 # (B, 14)
    y = y - jnp.max(y, axis=-1, keepdims=True)
    o_ref[...] = y - jnp.log(jnp.sum(jnp.exp(y), axis=-1, keepdims=True))


# ---------------------------------------------------------------------------
# parameter init (deterministic, synthetic; biases kept 2-D, QKV pre-fused)
# ---------------------------------------------------------------------------
def _lin_init(key, fan_in, fan_out):
    kw, kb = jax.random.split(key)
    w = 0.02 * jax.random.normal(kw, (fan_in, fan_out), jnp.float32)   # torch W.T layout
    b = 0.02 * jax.random.normal(kb, (1, fan_out), jnp.float32)
    return w, b


def init_params(key):
    keys = jax.random.split(key, 3 + N_LAYERS)
    scale = 1.0 / math.sqrt(HEAD_DIM)
    p = {
        "word_emb": 0.02 * jax.random.normal(keys[0], (VOCAB_PAD, HIDDEN), jnp.float32),
        "pos_emb": 0.02 * jax.random.normal(keys[1], (MAX_POS, HIDDEN), jnp.float32),
        "emb_ln_g": jnp.ones((1, HIDDEN), jnp.float32),
        "emb_ln_b": jnp.zeros((1, HIDDEN), jnp.float32),
        "layers": [],
    }
    for li in range(N_LAYERS):
        lk = jax.random.split(keys[2 + li], 6)
        wq, bq = _lin_init(lk[0], HIDDEN, HIDDEN)
        wk, bk = _lin_init(lk[1], HIDDEN, HIDDEN)
        wv, bv = _lin_init(lk[2], HIDDEN, HIDDEN)
        wo, bo = _lin_init(lk[3], HIDDEN, HIDDEN)
        w1, b1 = _lin_init(lk[4], HIDDEN, FFN_DIM)
        w2, b2 = _lin_init(lk[5], FFN_DIM, HIDDEN)
        layer = {
            # fused QKV with 1/sqrt(head_dim) folded into the Q slice
            "wqkv": jnp.concatenate([wq * scale, wk, wv], axis=1),   # (H, 3H)
            "bqkv": jnp.concatenate([bq * scale, bk, bv], axis=1),   # (1, 3H)
            "wo": wo, "bo": bo,
            "sa_ln_g": jnp.ones((1, HIDDEN), jnp.float32),
            "sa_ln_b": jnp.zeros((1, HIDDEN), jnp.float32),
            "w1": w1, "b1": b1, "w2": w2, "b2": b2,
            "out_ln_g": jnp.ones((1, HIDDEN), jnp.float32),
            "out_ln_b": jnp.zeros((1, HIDDEN), jnp.float32),
        }
        p["layers"].append(layer)

    cls_keys = jax.random.split(keys[2 + N_LAYERS], len(CLS_LAYERS) + 1)
    head = []
    fan_in = HIDDEN
    for i, dim in enumerate(CLS_LAYERS):
        head.append(_lin_init(cls_keys[i], fan_in, int(dim)))
        fan_in = int(dim)
    p["head"] = head
    p["head_out"] = _lin_init(cls_keys[-1], fan_in, MODEL_OUTPUT)
    return p


# ---------------------------------------------------------------------------
# forward pass: one pallas_call, everything VMEM-resident
# ---------------------------------------------------------------------------
def forward(params, input_ids, attention_mask):
    B, S = input_ids.shape
    BS = B * S

    ids2d = input_ids.reshape(BS, 1).astype(jnp.int32)
    pos2d = jnp.tile(jnp.arange(S, dtype=jnp.int32), B).reshape(BS, 1)  # constant-folded under jit
    mask = attention_mask.astype(jnp.int32)

    inputs = [ids2d, pos2d, mask,
              params["word_emb"], params["pos_emb"],
              params["emb_ln_g"], params["emb_ln_b"]]
    for layer in params["layers"]:
        inputs += [layer["wqkv"], layer["bqkv"], layer["wo"], layer["bo"],
                   layer["sa_ln_g"], layer["sa_ln_b"],
                   layer["w1"], layer["b1"], layer["w2"], layer["b2"],
                   layer["out_ln_g"], layer["out_ln_b"]]
    for (w, b) in params["head"]:
        inputs += [w, b]
    inputs += [params["head_out"][0], params["head_out"][1]]

    # TODO(synk): at real DistilBERT shapes (H=768, long S) this would need a
    # tiled GridSpec over the token axis + bf16 matmuls instead of whole-array
    # blocks; at these toy sizes everything fits comfortably in VMEM.
    return pl.pallas_call(
        functools.partial(_fused_forward_kernel, B, S),
        out_shape=jax.ShapeDtypeStruct((B, MODEL_OUTPUT), jnp.float32),
        in_specs=[_full_spec(a.shape) for a in inputs],
        out_specs=_full_spec((B, MODEL_OUTPUT)),
    )(*inputs)


# ---------------------------------------------------------------------------
if __name__ == "__main__":
    key = jax.random.PRNGKey(0)
    pkey, ikey = jax.random.split(key)

    params = init_params(pkey)

    B, S = 2, 8
    input_ids = jax.random.randint(ikey, (B, S), 0, VOCAB, dtype=jnp.int32)
    attention_mask = jnp.ones((B, S), jnp.int32).at[1, 6:].set(0)

    out = jax.jit(forward)(params, input_ids, attention_mask)
    out = jax.block_until_ready(out)

    assert out.shape == (B, MODEL_OUTPUT)
    # rows of log_softmax should sum (in prob space) to 1
    assert bool(jnp.all(jnp.abs(jnp.sum(jnp.exp(out), axis=1) - 1.0) < 1e-4))
    print("KERNEL_OK")
</pallas_src>

<mosaic_0001>
module attributes {stable_mosaic.version = 11 : i64} {
  func.func @_fused_forward_kernel(%arg0: memref<16x1xi32, #tpu.memory_space<vmem>>, %arg1: memref<16x1xi32, #tpu.memory_space<vmem>>, %arg2: memref<2x8xi32, #tpu.memory_space<vmem>>, %arg3: memref<128x32xf32, #tpu.memory_space<vmem>>, %arg4: memref<16x32xf32, #tpu.memory_space<vmem>>, %arg5: memref<1x32xf32, #tpu.memory_space<vmem>>, %arg6: memref<1x32xf32, #tpu.memory_space<vmem>>, %arg7: memref<32x96xf32, #tpu.memory_space<vmem>>, %arg8: memref<1x96xf32, #tpu.memory_space<vmem>>, %arg9: memref<32x32xf32, #tpu.memory_space<vmem>>, %arg10: memref<1x32xf32, #tpu.memory_space<vmem>>, %arg11: memref<1x32xf32, #tpu.memory_space<vmem>>, %arg12: memref<1x32xf32, #tpu.memory_space<vmem>>, %arg13: memref<32x64xf32, #tpu.memory_space<vmem>>, %arg14: memref<1x64xf32, #tpu.memory_space<vmem>>, %arg15: memref<64x32xf32, #tpu.memory_space<vmem>>, %arg16: memref<1x32xf32, #tpu.memory_space<vmem>>, %arg17: memref<1x32xf32, #tpu.memory_space<vmem>>, %arg18: memref<1x32xf32, #tpu.memory_space<vmem>>, %arg19: memref<32x96xf32, #tpu.memory_space<vmem>>, %arg20: memref<1x96xf32, #tpu.memory_space<vmem>>, %arg21: memref<32x32xf32, #tpu.memory_space<vmem>>, %arg22: memref<1x32xf32, #tpu.memory_space<vmem>>, %arg23: memref<1x32xf32, #tpu.memory_space<vmem>>, %arg24: memref<1x32xf32, #tpu.memory_space<vmem>>, %arg25: memref<32x64xf32, #tpu.memory_space<vmem>>, %arg26: memref<1x64xf32, #tpu.memory_space<vmem>>, %arg27: memref<64x32xf32, #tpu.memory_space<vmem>>, %arg28: memref<1x32xf32, #tpu.memory_space<vmem>>, %arg29: memref<1x32xf32, #tpu.memory_space<vmem>>, %arg30: memref<1x32xf32, #tpu.memory_space<vmem>>, %arg31: memref<32x24xf32, #tpu.memory_space<vmem>>, %arg32: memref<1x24xf32, #tpu.memory_space<vmem>>, %arg33: memref<24x20xf32, #tpu.memory_space<vmem>>, %arg34: memref<1x20xf32, #tpu.memory_space<vmem>>, %arg35: memref<20x14xf32, #tpu.memory_space<vmem>>, %arg36: memref<1x14xf32, #tpu.memory_space<vmem>>, %arg37: memref<2x14xf32, #tpu.memory_space<vmem>>) attributes {dimension_semantics = [], scalar_prefetch = 0 : i64, scratch_operands = 0 : i64, tpu.core_type = #tpu.core_type<tc>} {
    %c0 = arith.constant 0 : index
    %c0_0 = arith.constant 0 : index
    %0 = vector.load %arg0[%c0, %c0_0] : memref<16x1xi32, #tpu.memory_space<vmem>>, vector<16x1xi32>
    %c0_1 = arith.constant 0 : index
    %c0_2 = arith.constant 0 : index
    %1 = vector.load %arg1[%c0_1, %c0_2] : memref<16x1xi32, #tpu.memory_space<vmem>>, vector<16x1xi32>
    %2 = tpu.iota {dimensions = array<i32: 1>} : vector<16x128xi32>
    %3 = vector.broadcast %0 : vector<16x1xi32> to vector<16x128xi32>
    %4 = arith.cmpi eq, %2, %3 : vector<16x128xi32>
    %5 = arith.extui %4 : vector<16x128xi1> to vector<16x128xi32>
    %6 = arith.sitofp %5 : vector<16x128xi32> to vector<16x128xf32>
    %7 = tpu.iota {dimensions = array<i32: 1>} : vector<16x16xi32>
    %8 = vector.broadcast %1 : vector<16x1xi32> to vector<16x16xi32>
    %9 = arith.cmpi eq, %7, %8 : vector<16x16xi32>
    %10 = arith.extui %9 : vector<16x16xi1> to vector<16x16xi32>
    %11 = arith.sitofp %10 : vector<16x16xi32> to vector<16x16xf32>
    %c0_3 = arith.constant 0 : index
    %c0_4 = arith.constant 0 : index
    %12 = vector.load %arg3[%c0_3, %c0_4] : memref<128x32xf32, #tpu.memory_space<vmem>>, vector<128x32xf32>
    %cst = arith.constant dense<0.000000e+00> : vector<16x32xf32>
    %13 = tpu.matmul %6, %12, %cst {dimension_numbers = #tpu.dot_dimension_numbers<[1], [0], [0], [1], [0, 0, 1, 1], [], []>} : vector<16x128xf32>, vector<128x32xf32>, vector<16x32xf32> -> vector<16x32xf32>
    %c0_5 = arith.constant 0 : index
    %c0_6 = arith.constant 0 : index
    %14 = vector.load %arg4[%c0_5, %c0_6] : memref<16x32xf32, #tpu.memory_space<vmem>>, vector<16x32xf32>
    %cst_7 = arith.constant dense<0.000000e+00> : vector<16x32xf32>
    %15 = tpu.matmul %11, %14, %cst_7 {dimension_numbers = #tpu.dot_dimension_numbers<[1], [0], [0], [1], [0, 0, 1, 1], [], []>} : vector<16x16xf32>, vector<16x32xf32>, vector<16x32xf32> -> vector<16x32xf32>
    %16 = arith.addf %13, %15 : vector<16x32xf32>
    %c0_8 = arith.constant 0 : index
    %c0_9 = arith.constant 0 : index
    %17 = vector.load %arg5[%c0_8, %c0_9] : memref<1x32xf32, #tpu.memory_space<vmem>>, vector<1x32xf32>
    %c0_10 = arith.constant 0 : index
    %c0_11 = arith.constant 0 : index
    %18 = vector.load %arg6[%c0_10, %c0_11] : memref<1x32xf32, #tpu.memory_space<vmem>>, vector<1x32xf32>
    %cst_12 = arith.constant dense<0.000000e+00> : vector<16xf32>
    %19 = vector.multi_reduction <add>, %16, %cst_12 [1] : vector<16x32xf32> to vector<16xf32>
    %20 = vector.shape_cast %19 : vector<16xf32> to vector<16x1xf32>
    %cst_13 = arith.constant 3.200000e+01 : f32
    %21 = vector.broadcast %cst_13 : f32 to vector<16x1xf32>
    %22 = arith.divf %20, %21 : vector<16x1xf32>
    %23 = vector.broadcast %22 : vector<16x1xf32> to vector<16x32xf32>
    %24 = arith.subf %16, %23 : vector<16x32xf32>
    %25 = arith.mulf %24, %24 : vector<16x32xf32>
    %cst_14 = arith.constant dense<0.000000e+00> : vector<16xf32>
    %26 = vector.multi_reduction <add>, %25, %cst_14 [1] : vector<16x32xf32> to vector<16xf32>
    %27 = vector.shape_cast %26 : vector<16xf32> to vector<16x1xf32>
    %cst_15 = arith.constant 3.200000e+01 : f32
    %28 = vector.broadcast %cst_15 : f32 to vector<16x1xf32>
    %29 = arith.divf %27, %28 : vector<16x1xf32>
    %cst_16 = arith.constant 9.99999996E-13 : f32
    %30 = vector.broadcast %cst_16 : f32 to vector<16x1xf32>
    %31 = arith.addf %29, %30 : vector<16x1xf32>
    %32 = math.rsqrt %31 : vector<16x1xf32>
    %33 = vector.broadcast %32 : vector<16x1xf32> to vector<16x32xf32>
    %34 = arith.mulf %24, %33 : vector<16x32xf32>
    %35 = vector.broadcast %17 : vector<1x32xf32> to vector<16x32xf32>
    %36 = arith.mulf %34, %35 : vector<16x32xf32>
    %37 = vector.broadcast %18 : vector<1x32xf32> to vector<16x32xf32>
    %38 = arith.addf %36, %37 : vector<16x32xf32>
    %c0_17 = arith.constant 0 : index
    %c0_18 = arith.constant 0 : index
    %39 = vector.load %arg2[%c0_17, %c0_18] : memref<2x8xi32, #tpu.memory_space<vmem>>, vector<2x8xi32>
    %40 = arith.sitofp %39 : vector<2x8xi32> to vector<2x8xf32>
    %cst_19 = arith.constant 1.000000e+00 : f32
    %41 = vector.broadcast %cst_19 : f32 to vector<2x8xf32>
    %42 = arith.subf %41, %40 : vector<2x8xf32>
    %cst_20 = arith.constant -1.000000e+09 : f32
    %43 = vector.broadcast %cst_20 : f32 to vector<2x8xf32>
    %44 = arith.mulf %42, %43 : vector<2x8xf32>
    %c0_21 = arith.constant 0 : index
    %c0_22 = arith.constant 0 : index
    %45 = vector.load %arg7[%c0_21, %c0_22] : memref<32x96xf32, #tpu.memory_space<vmem>>, vector<32x96xf32>
    %cst_23 = arith.constant dense<0.000000e+00> : vector<16x96xf32>
    %46 = tpu.matmul %38, %45, %cst_23 {dimension_numbers = #tpu.dot_dimension_numbers<[1], [0], [0], [1], [0, 0, 1, 1], [], []>} : vector<16x32xf32>, vector<32x96xf32>, vector<16x96xf32> -> vector<16x96xf32>
    %c0_24 = arith.constant 0 : index
    %c0_25 = arith.constant 0 : index
    %47 = vector.load %arg8[%c0_24, %c0_25] : memref<1x96xf32, #tpu.memory_space<vmem>>, vector<1x96xf32>
    %48 = vector.broadcast %47 : vector<1x96xf32> to vector<16x96xf32>
    %49 = arith.addf %46, %48 : vector<16x96xf32>
    %50 = vector.extract_strided_slice %44 {offsets = [0, 0], sizes = [1, 8], strides = [1, 1]} : vector<2x8xf32> to vector<1x8xf32>
    %51 = vector.extract_strided_slice %49 {offsets = [0, 0], sizes = [8, 16], strides = [1, 1]} : vector<16x96xf32> to vector<8x16xf32>
    %52 = vector.extract_strided_slice %49 {offsets = [0, 32], sizes = [8, 16], strides = [1, 1]} : vector<16x96xf32> to vector<8x16xf32>
    %53 = vector.extract_strided_slice %49 {offsets = [0, 64], sizes = [8, 16], strides = [1, 1]} : vector<16x96xf32> to vector<8x16xf32>
    %cst_26 = arith.constant dense<0.000000e+00> : vector<8x8xf32>
    %54 = tpu.matmul %51, %52, %cst_26 {dimension_numbers = #tpu.dot_dimension_numbers<[1], [1], [0], [0], [0, 0, 1, 0], [], []>} : vector<8x16xf32>, vector<8x16xf32>, vector<8x8xf32> -> vector<8x8xf32>
    %55 = vector.broadcast %50 : vector<1x8xf32> to vector<8x8xf32>
    %56 = arith.addf %54, %55 : vector<8x8xf32>
    %cst_27 = arith.constant dense<0xFF800000> : vector<8xf32>
    %57 = vector.multi_reduction <maximumf>, %56, %cst_27 [1] : vector<8x8xf32> to vector<8xf32>
    %58 = vector.shape_cast %57 : vector<8xf32> to vector<8x1xf32>
    %59 = vector.broadcast %58 : vector<8x1xf32> to vector<8x8xf32>
    %60 = arith.subf %56, %59 : vector<8x8xf32>
    %61 = math.exp %60 : vector<8x8xf32>
    %cst_28 = arith.constant dense<0.000000e+00> : vector<8xf32>
    %62 = vector.multi_reduction <add>, %61, %cst_28 [1] : vector<8x8xf32> to vector<8xf32>
    %63 = vector.shape_cast %62 : vector<8xf32> to vector<8x1xf32>
    %64 = tpu.reciprocal %63 {approx = true} : vector<8x1xf32> -> vector<8x1xf32>
    %65 = vector.broadcast %64 : vector<8x1xf32> to vector<8x8xf32>
    %66 = arith.mulf %61, %65 : vector<8x8xf32>
    %cst_29 = arith.constant dense<0.000000e+00> : vector<8x16xf32>
    %67 = tpu.matmul %66, %53, %cst_29 {dimension_numbers = #tpu.dot_dimension_numbers<[1], [0], [0], [1], [0, 0, 1, 1], [], []>} : vector<8x8xf32>, vector<8x16xf32>, vector<8x16xf32> -> vector<8x16xf32>
    %68 = vector.extract_strided_slice %49 {offsets = [0, 16], sizes = [8, 16], strides = [1, 1]} : vector<16x96xf32> to vector<8x16xf32>
    %69 = vector.extract_strided_slice %49 {offsets = [0, 48], sizes = [8, 16], strides = [1, 1]} : vector<16x96xf32> to vector<8x16xf32>
    %70 = vector.extract_strided_slice %49 {offsets = [0, 80], sizes = [8, 16], strides = [1, 1]} : vector<16x96xf32> to vector<8x16xf32>
    %cst_30 = arith.constant dense<0.000000e+00> : vector<8x8xf32>
    %71 = tpu.matmul %68, %69, %cst_30 {dimension_numbers = #tpu.dot_dimension_numbers<[1], [1], [0], [0], [0, 0, 1, 0], [], []>} : vector<8x16xf32>, vector<8x16xf32>, vector<8x8xf32> -> vector<8x8xf32>
    %72 = vector.broadcast %50 : vector<1x8xf32> to vector<8x8xf32>
    %73 = arith.addf %71, %72 : vector<8x8xf32>
    %cst_31 = arith.constant dense<0xFF800000> : vector<8xf32>
    %74 = vector.multi_reduction <maximumf>, %73, %cst_31 [1] : vector<8x8xf32> to vector<8xf32>
    %75 = vector.shape_cast %74 : vector<8xf32> to vector<8x1xf32>
    %76 = vector.broadcast %75 : vector<8x1xf32> to vector<8x8xf32>
    %77 = arith.subf %73, %76 : vector<8x8xf32>
    %78 = math.exp %77 : vector<8x8xf32>
    %cst_32 = arith.constant dense<0.000000e+00> : vector<8xf32>
    %79 = vector.multi_reduction <add>, %78, %cst_32 [1] : vector<8x8xf32> to vector<8xf32>
    %80 = vector.shape_cast %79 : vector<8xf32> to vector<8x1xf32>
    %81 = tpu.reciprocal %80 {approx = true} : vector<8x1xf32> -> vector<8x1xf32>
    %82 = vector.broadcast %81 : vector<8x1xf32> to vector<8x8xf32>
    %83 = arith.mulf %78, %82 : vector<8x8xf32>
    %cst_33 = arith.constant dense<0.000000e+00> : vector<8x16xf32>
    %84 = tpu.matmul %83, %70, %cst_33 {dimension_numbers = #tpu.dot_dimension_numbers<[1], [0], [0], [1], [0, 0, 1, 1], [], []>} : vector<8x8xf32>, vector<8x16xf32>, vector<8x16xf32> -> vector<8x16xf32>
    %85 = tpu.concatenate %67, %84 in 1 : vector<8x16xf32>, vector<8x16xf32> -> vector<8x32xf32>
    %86 = vector.extract_strided_slice %44 {offsets = [1, 0], sizes = [1, 8], strides = [1, 1]} : vector<2x8xf32> to vector<1x8xf32>
    %87 = vector.extract_strided_slice %49 {offsets = [8, 0], sizes = [8, 16], strides = [1, 1]} : vector<16x96xf32> to vector<8x16xf32>
    %88 = vector.extract_strided_slice %49 {offsets = [8, 32], sizes = [8, 16], strides = [1, 1]} : vector<16x96xf32> to vector<8x16xf32>
    %89 = vector.extract_strided_slice %49 {offsets = [8, 64], sizes = [8, 16], strides = [1, 1]} : vector<16x96xf32> to vector<8x16xf32>
    %cst_34 = arith.constant dense<0.000000e+00> : vector<8x8xf32>
    %90 = tpu.matmul %87, %88, %cst_34 {dimension_numbers = #tpu.dot_dimension_numbers<[1], [1], [0], [0], [0, 0, 1, 0], [], []>} : vector<8x16xf32>, vector<8x16xf32>, vector<8x8xf32> -> vector<8x8xf32>
    %91 = vector.broadcast %86 : vector<1x8xf32> to vector<8x8xf32>
    %92 = arith.addf %90, %91 : vector<8x8xf32>
    %cst_35 = arith.constant dense<0xFF800000> : vector<8xf32>
    %93 = vector.multi_reduction <maximumf>, %92, %cst_35 [1] : vector<8x8xf32> to vector<8xf32>
    %94 = vector.shape_cast %93 : vector<8xf32> to vector<8x1xf32>
    %95 = vector.broadcast %94 : vector<8x1xf32> to vector<8x8xf32>
    %96 = arith.subf %92, %95 : vector<8x8xf32>
    %97 = math.exp %96 : vector<8x8xf32>
    %cst_36 = arith.constant dense<0.000000e+00> : vector<8xf32>
    %98 = vector.multi_reduction <add>, %97, %cst_36 [1] : vector<8x8xf32> to vector<8xf32>
    %99 = vector.shape_cast %98 : vector<8xf32> to vector<8x1xf32>
    %100 = tpu.reciprocal %99 {approx = true} : vector<8x1xf32> -> vector<8x1xf32>
    %101 = vector.broadcast %100 : vector<8x1xf32> to vector<8x8xf32>
    %102 = arith.mulf %97, %101 : vector<8x8xf32>
    %cst_37 = arith.constant dense<0.000000e+00> : vector<8x16xf32>
    %103 = tpu.matmul %102, %89, %cst_37 {dimension_numbers = #tpu.dot_dimension_numbers<[1], [0], [0], [1], [0, 0, 1, 1], [], []>} : vector<8x8xf32>, vector<8x16xf32>, vector<8x16xf32> -> vector<8x16xf32>
    %104 = vector.extract_strided_slice %49 {offsets = [8, 16], sizes = [8, 16], strides = [1, 1]} : vector<16x96xf32> to vector<8x16xf32>
    %105 = vector.extract_strided_slice %49 {offsets = [8, 48], sizes = [8, 16], strides = [1, 1]} : vector<16x96xf32> to vector<8x16xf32>
    %106 = vector.extract_strided_slice %49 {offsets = [8, 80], sizes = [8, 16], strides = [1, 1]} : vector<16x96xf32> to vector<8x16xf32>
    %cst_38 = arith.constant dense<0.000000e+00> : vector<8x8xf32>
    %107 = tpu.matmul %104, %105, %cst_38 {dimension_numbers = #tpu.dot_dimension_numbers<[1], [1], [0], [0], [0, 0, 1, 0], [], []>} : vector<8x16xf32>, vector<8x16xf32>, vector<8x8xf32> -> vector<8x8xf32>
    %108 = vector.broadcast %86 : vector<1x8xf32> to vector<8x8xf32>
    %109 = arith.addf %107, %108 : vector<8x8xf32>
    %cst_39 = arith.constant dense<0xFF800000> : vector<8xf32>
    %110 = vector.multi_reduction <maximumf>, %109, %cst_39 [1] : vector<8x8xf32> to vector<8xf32>
    %111 = vector.shape_cast %110 : vector<8xf32> to vector<8x1xf32>
    %112 = vector.broadcast %111 : vector<8x1xf32> to vector<8x8xf32>
    %113 = arith.subf %109, %112 : vector<8x8xf32>
    %114 = math.exp %113 : vector<8x8xf32>
    %cst_40 = arith.constant dense<0.000000e+00> : vector<8xf32>
    %115 = vector.multi_reduction <add>, %114, %cst_40 [1] : vector<8x8xf32> to vector<8xf32>
    %116 = vector.shape_cast %115 : vector<8xf32> to vector<8x1xf32>
    %117 = tpu.reciprocal %116 {approx = true} : vector<8x1xf32> -> vector<8x1xf32>
    %118 = vector.broadcast %117 : vector<8x1xf32> to vector<8x8xf32>
    %119 = arith.mulf %114, %118 : vector<8x8xf32>
    %cst_41 = arith.constant dense<0.000000e+00> : vector<8x16xf32>
    %120 = tpu.matmul %119, %106, %cst_41 {dimension_numbers = #tpu.dot_dimension_numbers<[1], [0], [0], [1], [0, 0, 1, 1], [], []>} : vector<8x8xf32>, vector<8x16xf32>, vector<8x16xf32> -> vector<8x16xf32>
    %121 = tpu.concatenate %103, %120 in 1 : vector<8x16xf32>, vector<8x16xf32> -> vector<8x32xf32>
    %122 = tpu.concatenate %85, %121 in 0 : vector<8x32xf32>, vector<8x32xf32> -> vector<16x32xf32>
    %c0_42 = arith.constant 0 : index
    %c0_43 = arith.constant 0 : index
    %123 = vector.load %arg9[%c0_42, %c0_43] : memref<32x32xf32, #tpu.memory_space<vmem>>, vector<32x32xf32>
    %cst_44 = arith.constant dense<0.000000e+00> : vector<16x32xf32>
    %124 = tpu.matmul %122, %123, %cst_44 {dimension_numbers = #tpu.dot_dimension_numbers<[1], [0], [0], [1], [0, 0, 1, 1], [], []>} : vector<16x32xf32>, vector<32x32xf32>, vector<16x32xf32> -> vector<16x32xf32>
    %c0_45 = arith.constant 0 : index
    %c0_46 = arith.constant 0 : index
    %125 = vector.load %arg10[%c0_45, %c0_46] : memref<1x32xf32, #tpu.memory_space<vmem>>, vector<1x32xf32>
    %126 = vector.broadcast %125 : vector<1x32xf32> to vector<16x32xf32>
    %127 = arith.addf %124, %126 : vector<16x32xf32>
    %128 = arith.addf %127, %38 : vector<16x32xf32>
    %c0_47 = arith.constant 0 : index
    %c0_48 = arith.constant 0 : index
    %129 = vector.load %arg11[%c0_47, %c0_48] : memref<1x32xf32, #tpu.memory_space<vmem>>, vector<1x32xf32>
    %c0_49 = arith.constant 0 : index
    %c0_50 = arith.constant 0 : index
    %130 = vector.load %arg12[%c0_49, %c0_50] : memref<1x32xf32, #tpu.memory_space<vmem>>, vector<1x32xf32>
    %cst_51 = arith.constant dense<0.000000e+00> : vector<16xf32>
    %131 = vector.multi_reduction <add>, %128, %cst_51 [1] : vector<16x32xf32> to vector<16xf32>
    %132 = vector.shape_cast %131 : vector<16xf32> to vector<16x1xf32>
    %cst_52 = arith.constant 3.200000e+01 : f32
    %133 = vector.broadcast %cst_52 : f32 to vector<16x1xf32>
    %134 = arith.divf %132, %133 : vector<16x1xf32>
    %135 = vector.broadcast %134 : vector<16x1xf32> to vector<16x32xf32>
    %136 = arith.subf %128, %135 : vector<16x32xf32>
    %137 = arith.mulf %136, %136 : vector<16x32xf32>
    %cst_53 = arith.constant dense<0.000000e+00> : vector<16xf32>
    %138 = vector.multi_reduction <add>, %137, %cst_53 [1] : vector<16x32xf32> to vector<16xf32>
    %139 = vector.shape_cast %138 : vector<16xf32> to vector<16x1xf32>
    %cst_54 = arith.constant 3.200000e+01 : f32
    %140 = vector.broadcast %cst_54 : f32 to vector<16x1xf32>
    %141 = arith.divf %139, %140 : vector<16x1xf32>
    %cst_55 = arith.constant 9.99999996E-13 : f32
    %142 = vector.broadcast %cst_55 : f32 to vector<16x1xf32>
    %143 = arith.addf %141, %142 : vector<16x1xf32>
    %144 = math.rsqrt %143 : vector<16x1xf32>
    %145 = vector.broadcast %144 : vector<16x1xf32> to vector<16x32xf32>
    %146 = arith.mulf %136, %145 : vector<16x32xf32>
    %147 = vector.broadcast %129 : vector<1x32xf32> to vector<16x32xf32>
    %148 = arith.mulf %146, %147 : vector<16x32xf32>
    %149 = vector.broadcast %130 : vector<1x32xf32> to vector<16x32xf32>
    %150 = arith.addf %148, %149 : vector<16x32xf32>
    %c0_56 = arith.constant 0 : index
    %c0_57 = arith.constant 0 : index
    %151 = vector.load %arg13[%c0_56, %c0_57] : memref<32x64xf32, #tpu.memory_space<vmem>>, vector<32x64xf32>
    %cst_58 = arith.constant dense<0.000000e+00> : vector<16x64xf32>
    %152 = tpu.matmul %150, %151, %cst_58 {dimension_numbers = #tpu.dot_dimension_numbers<[1], [0], [0], [1], [0, 0, 1, 1], [], []>} : vector<16x32xf32>, vector<32x64xf32>, vector<16x64xf32> -> vector<16x64xf32>
    %c0_59 = arith.constant 0 : index
    %c0_60 = arith.constant 0 : index
    %153 = vector.load %arg14[%c0_59, %c0_60] : memref<1x64xf32, #tpu.memory_space<vmem>>, vector<1x64xf32>
    %154 = vector.broadcast %153 : vector<1x64xf32> to vector<16x64xf32>
    %155 = arith.addf %152, %154 : vector<16x64xf32>
    %cst_61 = arith.constant 5.000000e-01 : f32
    %156 = vector.broadcast %cst_61 : f32 to vector<16x64xf32>
    %157 = arith.mulf %156, %155 : vector<16x64xf32>
    %cst_62 = arith.constant 4.471500e-02 : f32
    %158 = vector.broadcast %cst_62 : f32 to vector<16x64xf32>
    %159 = arith.mulf %158, %155 : vector<16x64xf32>
    %160 = arith.mulf %159, %155 : vector<16x64xf32>
    %161 = arith.mulf %160, %155 : vector<16x64xf32>
    %162 = arith.addf %155, %161 : vector<16x64xf32>
    %cst_63 = arith.constant 0.797884583 : f32
    %163 = vector.broadcast %cst_63 : f32 to vector<16x64xf32>
    %164 = arith.mulf %163, %162 : vector<16x64xf32>
    %165 = math.tanh %164 : vector<16x64xf32>
    %cst_64 = arith.constant 1.000000e+00 : f32
    %166 = vector.broadcast %cst_64 : f32 to vector<16x64xf32>
    %167 = arith.addf %166, %165 : vector<16x64xf32>
    %168 = arith.mulf %157, %167 : vector<16x64xf32>
    %c0_65 = arith.constant 0 : index
    %c0_66 = arith.constant 0 : index
    %169 = vector.load %arg15[%c0_65, %c0_66] : memref<64x32xf32, #tpu.memory_space<vmem>>, vector<64x32xf32>
    %cst_67 = arith.constant dense<0.000000e+00> : vector<16x32xf32>
    %170 = tpu.matmul %168, %169, %cst_67 {dimension_numbers = #tpu.dot_dimension_numbers<[1], [0], [0], [1], [0, 0, 1, 1], [], []>} : vector<16x64xf32>, vector<64x32xf32>, vector<16x32xf32> -> vector<16x32xf32>
    %c0_68 = arith.constant 0 : index
    %c0_69 = arith.constant 0 : index
    %171 = vector.load %arg16[%c0_68, %c0_69] : memref<1x32xf32, #tpu.memory_space<vmem>>, vector<1x32xf32>
    %172 = vector.broadcast %171 : vector<1x32xf32> to vector<16x32xf32>
    %173 = arith.addf %170, %172 : vector<16x32xf32>
    %174 = arith.addf %173, %150 : vector<16x32xf32>
    %c0_70 = arith.constant 0 : index
    %c0_71 = arith.constant 0 : index
    %175 = vector.load %arg17[%c0_70, %c0_71] : memref<1x32xf32, #tpu.memory_space<vmem>>, vector<1x32xf32>
    %c0_72 = arith.constant 0 : index
    %c0_73 = arith.constant 0 : index
    %176 = vector.load %arg18[%c0_72, %c0_73] : memref<1x32xf32, #tpu.memory_space<vmem>>, vector<1x32xf32>
    %cst_74 = arith.constant dense<0.000000e+00> : vector<16xf32>
    %177 = vector.multi_reduction <add>, %174, %cst_74 [1] : vector<16x32xf32> to vector<16xf32>
    %178 = vector.shape_cast %177 : vector<16xf32> to vector<16x1xf32>
    %cst_75 = arith.constant 3.200000e+01 : f32
    %179 = vector.broadcast %cst_75 : f32 to vector<16x1xf32>
    %180 = arith.divf %178, %179 : vector<16x1xf32>
    %181 = vector.broadcast %180 : vector<16x1xf32> to vector<16x32xf32>
    %182 = arith.subf %174, %181 : vector<16x32xf32>
    %183 = arith.mulf %182, %182 : vector<16x32xf32>
    %cst_76 = arith.constant dense<0.000000e+00> : vector<16xf32>
    %184 = vector.multi_reduction <add>, %183, %cst_76 [1] : vector<16x32xf32> to vector<16xf32>
    %185 = vector.shape_cast %184 : vector<16xf32> to vector<16x1xf32>
    %cst_77 = arith.constant 3.200000e+01 : f32
    %186 = vector.broadcast %cst_77 : f32 to vector<16x1xf32>
    %187 = arith.divf %185, %186 : vector<16x1xf32>
    %cst_78 = arith.constant 9.99999996E-13 : f32
    %188 = vector.broadcast %cst_78 : f32 to vector<16x1xf32>
    %189 = arith.addf %187, %188 : vector<16x1xf32>
    %190 = math.rsqrt %189 : vector<16x1xf32>
    %191 = vector.broadcast %190 : vector<16x1xf32> to vector<16x32xf32>
    %192 = arith.mulf %182, %191 : vector<16x32xf32>
    %193 = vector.broadcast %175 : vector<1x32xf32> to vector<16x32xf32>
    %194 = arith.mulf %192, %193 : vector<16x32xf32>
    %195 = vector.broadcast %176 : vector<1x32xf32> to vector<16x32xf32>
    %196 = arith.addf %194, %195 : vector<16x32xf32>
    %c0_79 = arith.constant 0 : index
    %c0_80 = arith.constant 0 : index
    %197 = vector.load %arg19[%c0_79, %c0_80] : memref<32x96xf32, #tpu.memory_space<vmem>>, vector<32x96xf32>
    %cst_81 = arith.constant dense<0.000000e+00> : vector<16x96xf32>
    %198 = tpu.matmul %196, %197, %cst_81 {dimension_numbers = #tpu.dot_dimension_numbers<[1], [0], [0], [1], [0, 0, 1, 1], [], []>} : vector<16x32xf32>, vector<32x96xf32>, vector<16x96xf32> -> vector<16x96xf32>
    %c0_82 = arith.constant 0 : index
    %c0_83 = arith.constant 0 : index
    %199 = vector.load %arg20[%c0_82, %c0_83] : memref<1x96xf32, #tpu.memory_space<vmem>>, vector<1x96xf32>
    %200 = vector.broadcast %199 : vector<1x96xf32> to vector<16x96xf32>
    %201 = arith.addf %198, %200 : vector<16x96xf32>
    %202 = vector.extract_strided_slice %44 {offsets = [0, 0], sizes = [1, 8], strides = [1, 1]} : vector<2x8xf32> to vector<1x8xf32>
    %203 = vector.extract_strided_slice %201 {offsets = [0, 0], sizes = [8, 16], strides = [1, 1]} : vector<16x96xf32> to vector<8x16xf32>
    %204 = vector.extract_strided_slice %201 {offsets = [0, 32], sizes = [8, 16], strides = [1, 1]} : vector<16x96xf32> to vector<8x16xf32>
    %205 = vector.extract_strided_slice %201 {offsets = [0, 64], sizes = [8, 16], strides = [1, 1]} : vector<16x96xf32> to vector<8x16xf32>
    %cst_84 = arith.constant dense<0.000000e+00> : vector<8x8xf32>
    %206 = tpu.matmul %203, %204, %cst_84 {dimension_numbers = #tpu.dot_dimension_numbers<[1], [1], [0], [0], [0, 0, 1, 0], [], []>} : vector<8x16xf32>, vector<8x16xf32>, vector<8x8xf32> -> vector<8x8xf32>
    %207 = vector.broadcast %202 : vector<1x8xf32> to vector<8x8xf32>
    %208 = arith.addf %206, %207 : vector<8x8xf32>
    %cst_85 = arith.constant dense<0xFF800000> : vector<8xf32>
    %209 = vector.multi_reduction <maximumf>, %208, %cst_85 [1] : vector<8x8xf32> to vector<8xf32>
    %210 = vector.shape_cast %209 : vector<8xf32> to vector<8x1xf32>
    %211 = vector.broadcast %210 : vector<8x1xf32> to vector<8x8xf32>
    %212 = arith.subf %208, %211 : vector<8x8xf32>
    %213 = math.exp %212 : vector<8x8xf32>
    %cst_86 = arith.constant dense<0.000000e+00> : vector<8xf32>
    %214 = vector.multi_reduction <add>, %213, %cst_86 [1] : vector<8x8xf32> to vector<8xf32>
    %215 = vector.shape_cast %214 : vector<8xf32> to vector<8x1xf32>
    %216 = tpu.reciprocal %215 {approx = true} : vector<8x1xf32> -> vector<8x1xf32>
    %217 = vector.broadcast %216 : vector<8x1xf32> to vector<8x8xf32>
    %218 = arith.mulf %213, %217 : vector<8x8xf32>
    %cst_87 = arith.constant dense<0.000000e+00> : vector<8x16xf32>
    %219 = tpu.matmul %218, %205, %cst_87 {dimension_numbers = #tpu.dot_dimension_numbers<[1], [0], [0], [1], [0, 0, 1, 1], [], []>} : vector<8x8xf32>, vector<8x16xf32>, vector<8x16xf32> -> vector<8x16xf32>
    %220 = vector.extract_strided_slice %201 {offsets = [0, 16], sizes = [8, 16], strides = [1, 1]} : vector<16x96xf32> to vector<8x16xf32>
    %221 = vector.extract_strided_slice %201 {offsets = [0, 48], sizes = [8, 16], strides = [1, 1]} : vector<16x96xf32> to vector<8x16xf32>
    %222 = vector.extract_strided_slice %201 {offsets = [0, 80], sizes = [8, 16], strides = [1, 1]} : vector<16x96xf32> to vector<8x16xf32>
    %cst_88 = arith.constant dense<0.000000e+00> : vector<8x8xf32>
    %223 = tpu.matmul %220, %221, %cst_88 {dimension_numbers = #tpu.dot_dimension_numbers<[1], [1], [0], [0], [0, 0, 1, 0], [], []>} : vector<8x16xf32>, vector<8x16xf32>, vector<8x8xf32> -> vector<8x8xf32>
    %224 = vector.broadcast %202 : vector<1x8xf32> to vector<8x8xf32>
    %225 = arith.addf %223, %224 : vector<8x8xf32>
    %cst_89 = arith.constant dense<0xFF800000> : vector<8xf32>
    %226 = vector.multi_reduction <maximumf>, %225, %cst_89 [1] : vector<8x8xf32> to vector<8xf32>
    %227 = vector.shape_cast %226 : vector<8xf32> to vector<8x1xf32>
    %228 = vector.broadcast %227 : vector<8x1xf32> to vector<8x8xf32>
    %229 = arith.subf %225, %228 : vector<8x8xf32>
    %230 = math.exp %229 : vector<8x8xf32>
    %cst_90 = arith.constant dense<0.000000e+00> : vector<8xf32>
    %231 = vector.multi_reduction <add>, %230, %cst_90 [1] : vector<8x8xf32> to vector<8xf32>
    %232 = vector.shape_cast %231 : vector<8xf32> to vector<8x1xf32>
    %233 = tpu.reciprocal %232 {approx = true} : vector<8x1xf32> -> vector<8x1xf32>
    %234 = vector.broadcast %233 : vector<8x1xf32> to vector<8x8xf32>
    %235 = arith.mulf %230, %234 : vector<8x8xf32>
    %cst_91 = arith.constant dense<0.000000e+00> : vector<8x16xf32>
    %236 = tpu.matmul %235, %222, %cst_91 {dimension_numbers = #tpu.dot_dimension_numbers<[1], [0], [0], [1], [0, 0, 1, 1], [], []>} : vector<8x8xf32>, vector<8x16xf32>, vector<8x16xf32> -> vector<8x16xf32>
    %237 = tpu.concatenate %219, %236 in 1 : vector<8x16xf32>, vector<8x16xf32> -> vector<8x32xf32>
    %238 = vector.extract_strided_slice %44 {offsets = [1, 0], sizes = [1, 8], strides = [1, 1]} : vector<2x8xf32> to vector<1x8xf32>
    %239 = vector.extract_strided_slice %201 {offsets = [8, 0], sizes = [8, 16], strides = [1, 1]} : vector<16x96xf32> to vector<8x16xf32>
    %240 = vector.extract_strided_slice %201 {offsets = [8, 32], sizes = [8, 16], strides = [1, 1]} : vector<16x96xf32> to vector<8x16xf32>
    %241 = vector.extract_strided_slice %201 {offsets = [8, 64], sizes = [8, 16], strides = [1, 1]} : vector<16x96xf32> to vector<8x16xf32>
    %cst_92 = arith.constant dense<0.000000e+00> : vector<8x8xf32>
    %242 = tpu.matmul %239, %240, %cst_92 {dimension_numbers = #tpu.dot_dimension_numbers<[1], [1], [0], [0], [0, 0, 1, 0], [], []>} : vector<8x16xf32>, vector<8x16xf32>, vector<8x8xf32> -> vector<8x8xf32>
    %243 = vector.broadcast %238 : vector<1x8xf32> to vector<8x8xf32>
    %244 = arith.addf %242, %243 : vector<8x8xf32>
    %cst_93 = arith.constant dense<0xFF800000> : vector<8xf32>
    %245 = vector.multi_reduction <maximumf>, %244, %cst_93 [1] : vector<8x8xf32> to vector<8xf32>
    %246 = vector.shape_cast %245 : vector<8xf32> to vector<8x1xf32>
    %247 = vector.broadcast %246 : vector<8x1xf32> to vector<8x8xf32>
    %248 = arith.subf %244, %247 : vector<8x8xf32>
    %249 = math.exp %248 : vector<8x8xf32>
    %cst_94 = arith.constant dense<0.000000e+00> : vector<8xf32>
    %250 = vector.multi_reduction <add>, %249, %cst_94 [1] : vector<8x8xf32> to vector<8xf32>
    %251 = vector.shape_cast %250 : vector<8xf32> to vector<8x1xf32>
    %252 = tpu.reciprocal %251 {approx = true} : vector<8x1xf32> -> vector<8x1xf32>
    %253 = vector.broadcast %252 : vector<8x1xf32> to vector<8x8xf32>
    %254 = arith.mulf %249, %253 : vector<8x8xf32>
    %cst_95 = arith.constant dense<0.000000e+00> : vector<8x16xf32>
    %255 = tpu.matmul %254, %241, %cst_95 {dimension_numbers = #tpu.dot_dimension_numbers<[1], [0], [0], [1], [0, 0, 1, 1], [], []>} : vector<8x8xf32>, vector<8x16xf32>, vector<8x16xf32> -> vector<8x16xf32>
    %256 = vector.extract_strided_slice %201 {offsets = [8, 16], sizes = [8, 16], strides = [1, 1]} : vector<16x96xf32> to vector<8x16xf32>
    %257 = vector.extract_strided_slice %201 {offsets = [8, 48], sizes = [8, 16], strides = [1, 1]} : vector<16x96xf32> to vector<8x16xf32>
    %258 = vector.extract_strided_slice %201 {offsets = [8, 80], sizes = [8, 16], strides = [1, 1]} : vector<16x96xf32> to vector<8x16xf32>
    %cst_96 = arith.constant dense<0.000000e+00> : vector<8x8xf32>
    %259 = tpu.matmul %256, %257, %cst_96 {dimension_numbers = #tpu.dot_dimension_numbers<[1], [1], [0], [0], [0, 0, 1, 0], [], []>} : vector<8x16xf32>, vector<8x16xf32>, vector<8x8xf32> -> vector<8x8xf32>
    %260 = vector.broadcast %238 : vector<1x8xf32> to vector<8x8xf32>
    %261 = arith.addf %259, %260 : vector<8x8xf32>
    %cst_97 = arith.constant dense<0xFF800000> : vector<8xf32>
    %262 = vector.multi_reduction <maximumf>, %261, %cst_97 [1] : vector<8x8xf32> to vector<8xf32>
    %263 = vector.shape_cast %262 : vector<8xf32> to vector<8x1xf32>
    %264 = vector.broadcast %263 : vector<8x1xf32> to vector<8x8xf32>
    %265 = arith.subf %261, %264 : vector<8x8xf32>
    %266 = math.exp %265 : vector<8x8xf32>
    %cst_98 = arith.constant dense<0.000000e+00> : vector<8xf32>
    %267 = vector.multi_reduction <add>, %266, %cst_98 [1] : vector<8x8xf32> to vector<8xf32>
    %268 = vector.shape_cast %267 : vector<8xf32> to vector<8x1xf32>
    %269 = tpu.reciprocal %268 {approx = true} : vector<8x1xf32> -> vector<8x1xf32>
    %270 = vector.broadcast %269 : vector<8x1xf32> to vector<8x8xf32>
    %271 = arith.mulf %266, %270 : vector<8x8xf32>
    %cst_99 = arith.constant dense<0.000000e+00> : vector<8x16xf32>
    %272 = tpu.matmul %271, %258, %cst_99 {dimension_numbers = #tpu.dot_dimension_numbers<[1], [0], [0], [1], [0, 0, 1, 1], [], []>} : vector<8x8xf32>, vector<8x16xf32>, vector<8x16xf32> -> vector<8x16xf32>
    %273 = tpu.concatenate %255, %272 in 1 : vector<8x16xf32>, vector<8x16xf32> -> vector<8x32xf32>
    %274 = tpu.concatenate %237, %273 in 0 : vector<8x32xf32>, vector<8x32xf32> -> vector<16x32xf32>
    %c0_100 = arith.constant 0 : index
    %c0_101 = arith.constant 0 : index
    %275 = vector.load %arg21[%c0_100, %c0_101] : memref<32x32xf32, #tpu.memory_space<vmem>>, vector<32x32xf32>
    %cst_102 = arith.constant dense<0.000000e+00> : vector<16x32xf32>
    %276 = tpu.matmul %274, %275, %cst_102 {dimension_numbers = #tpu.dot_dimension_numbers<[1], [0], [0], [1], [0, 0, 1, 1], [], []>} : vector<16x32xf32>, vector<32x32xf32>, vector<16x32xf32> -> vector<16x32xf32>
    %c0_103 = arith.constant 0 : index
    %c0_104 = arith.constant 0 : index
    %277 = vector.load %arg22[%c0_103, %c0_104] : memref<1x32xf32, #tpu.memory_space<vmem>>, vector<1x32xf32>
    %278 = vector.broadcast %277 : vector<1x32xf32> to vector<16x32xf32>
    %279 = arith.addf %276, %278 : vector<16x32xf32>
    %280 = arith.addf %279, %196 : vector<16x32xf32>
    %c0_105 = arith.constant 0 : index
    %c0_106 = arith.constant 0 : index
    %281 = vector.load %arg23[%c0_105, %c0_106] : memref<1x32xf32, #tpu.memory_space<vmem>>, vector<1x32xf32>
    %c0_107 = arith.constant 0 : index
    %c0_108 = arith.constant 0 : index
    %282 = vector.load %arg24[%c0_107, %c0_108] : memref<1x32xf32, #tpu.memory_space<vmem>>, vector<1x32xf32>
    %cst_109 = arith.constant dense<0.000000e+00> : vector<16xf32>
    %283 = vector.multi_reduction <add>, %280, %cst_109 [1] : vector<16x32xf32> to vector<16xf32>
    %284 = vector.shape_cast %283 : vector<16xf32> to vector<16x1xf32>
    %cst_110 = arith.constant 3.200000e+01 : f32
    %285 = vector.broadcast %cst_110 : f32 to vector<16x1xf32>
    %286 = arith.divf %284, %285 : vector<16x1xf32>
    %287 = vector.broadcast %286 : vector<16x1xf32> to vector<16x32xf32>
    %288 = arith.subf %280, %287 : vector<16x32xf32>
    %289 = arith.mulf %288, %288 : vector<16x32xf32>
    %cst_111 = arith.constant dense<0.000000e+00> : vector<16xf32>
    %290 = vector.multi_reduction <add>, %289, %cst_111 [1] : vector<16x32xf32> to vector<16xf32>
    %291 = vector.shape_cast %290 : vector<16xf32> to vector<16x1xf32>
    %cst_112 = arith.constant 3.200000e+01 : f32
    %292 = vector.broadcast %cst_112 : f32 to vector<16x1xf32>
    %293 = arith.divf %291, %292 : vector<16x1xf32>
    %cst_113 = arith.constant 9.99999996E-13 : f32
    %294 = vector.broadcast %cst_113 : f32 to vector<16x1xf32>
    %295 = arith.addf %293, %294 : vector<16x1xf32>
    %296 = math.rsqrt %295 : vector<16x1xf32>
    %297 = vector.broadcast %296 : vector<16x1xf32> to vector<16x32xf32>
    %298 = arith.mulf %288, %297 : vector<16x32xf32>
    %299 = vector.broadcast %281 : vector<1x32xf32> to vector<16x32xf32>
    %300 = arith.mulf %298, %299 : vector<16x32xf32>
    %301 = vector.broadcast %282 : vector<1x32xf32> to vector<16x32xf32>
    %302 = arith.addf %300, %301 : vector<16x32xf32>
    %c0_114 = arith.constant 0 : index
    %c0_115 = arith.constant 0 : index
    %303 = vector.load %arg25[%c0_114, %c0_115] : memref<32x64xf32, #tpu.memory_space<vmem>>, vector<32x64xf32>
    %cst_116 = arith.constant dense<0.000000e+00> : vector<16x64xf32>
    %304 = tpu.matmul %302, %303, %cst_116 {dimension_numbers = #tpu.dot_dimension_numbers<[1], [0], [0], [1], [0, 0, 1, 1], [], []>} : vector<16x32xf32>, vector<32x64xf32>, vector<16x64xf32> -> vector<16x64xf32>
    %c0_117 = arith.constant 0 : index
    %c0_118 = arith.constant 0 : index
    %305 = vector.load %arg26[%c0_117, %c0_118] : memref<1x64xf32, #tpu.memory_space<vmem>>, vector<1x64xf32>
    %306 = vector.broadcast %305 : vector<1x64xf32> to vector<16x64xf32>
    %307 = arith.addf %304, %306 : vector<16x64xf32>
    %cst_119 = arith.constant 5.000000e-01 : f32
    %308 = vector.broadcast %cst_119 : f32 to vector<16x64xf32>
    %309 = arith.mulf %308, %307 : vector<16x64xf32>
    %cst_120 = arith.constant 4.471500e-02 : f32
    %310 = vector.broadcast %cst_120 : f32 to vector<16x64xf32>
    %311 = arith.mulf %310, %307 : vector<16x64xf32>
    %312 = arith.mulf %311, %307 : vector<16x64xf32>
    %313 = arith.mulf %312, %307 : vector<16x64xf32>
    %314 = arith.addf %307, %313 : vector<16x64xf32>
    %cst_121 = arith.constant 0.797884583 : f32
    %315 = vector.broadcast %cst_121 : f32 to vector<16x64xf32>
    %316 = arith.mulf %315, %314 : vector<16x64xf32>
    %317 = math.tanh %316 : vector<16x64xf32>
    %cst_122 = arith.constant 1.000000e+00 : f32
    %318 = vector.broadcast %cst_122 : f32 to vector<16x64xf32>
    %319 = arith.addf %318, %317 : vector<16x64xf32>
    %320 = arith.mulf %309, %319 : vector<16x64xf32>
    %c0_123 = arith.constant 0 : index
    %c0_124 = arith.constant 0 : index
    %321 = vector.load %arg27[%c0_123, %c0_124] : memref<64x32xf32, #tpu.memory_space<vmem>>, vector<64x32xf32>
    %cst_125 = arith.constant dense<0.000000e+00> : vector<16x32xf32>
    %322 = tpu.matmul %320, %321, %cst_125 {dimension_numbers = #tpu.dot_dimension_numbers<[1], [0], [0], [1], [0, 0, 1, 1], [], []>} : vector<16x64xf32>, vector<64x32xf32>, vector<16x32xf32> -> vector<16x32xf32>
    %c0_126 = arith.constant 0 : index
    %c0_127 = arith.constant 0 : index
    %323 = vector.load %arg28[%c0_126, %c0_127] : memref<1x32xf32, #tpu.memory_space<vmem>>, vector<1x32xf32>
    %324 = vector.broadcast %323 : vector<1x32xf32> to vector<16x32xf32>
    %325 = arith.addf %322, %324 : vector<16x32xf32>
    %326 = arith.addf %325, %302 : vector<16x32xf32>
    %c0_128 = arith.constant 0 : index
    %c0_129 = arith.constant 0 : index
    %327 = vector.load %arg29[%c0_128, %c0_129] : memref<1x32xf32, #tpu.memory_space<vmem>>, vector<1x32xf32>
    %c0_130 = arith.constant 0 : index
    %c0_131 = arith.constant 0 : index
    %328 = vector.load %arg30[%c0_130, %c0_131] : memref<1x32xf32, #tpu.memory_space<vmem>>, vector<1x32xf32>
    %cst_132 = arith.constant dense<0.000000e+00> : vector<16xf32>
    %329 = vector.multi_reduction <add>, %326, %cst_132 [1] : vector<16x32xf32> to vector<16xf32>
    %330 = vector.shape_cast %329 : vector<16xf32> to vector<16x1xf32>
    %cst_133 = arith.constant 3.200000e+01 : f32
    %331 = vector.broadcast %cst_133 : f32 to vector<16x1xf32>
    %332 = arith.divf %330, %331 : vector<16x1xf32>
    %333 = vector.broadcast %332 : vector<16x1xf32> to vector<16x32xf32>
    %334 = arith.subf %326, %333 : vector<16x32xf32>
    %335 = arith.mulf %334, %334 : vector<16x32xf32>
    %cst_134 = arith.constant dense<0.000000e+00> : vector<16xf32>
    %336 = vector.multi_reduction <add>, %335, %cst_134 [1] : vector<16x32xf32> to vector<16xf32>
    %337 = vector.shape_cast %336 : vector<16xf32> to vector<16x1xf32>
    %cst_135 = arith.constant 3.200000e+01 : f32
    %338 = vector.broadcast %cst_135 : f32 to vector<16x1xf32>
    %339 = arith.divf %337, %338 : vector<16x1xf32>
    %cst_136 = arith.constant 9.99999996E-13 : f32
    %340 = vector.broadcast %cst_136 : f32 to vector<16x1xf32>
    %341 = arith.addf %339, %340 : vector<16x1xf32>
    %342 = math.rsqrt %341 : vector<16x1xf32>
    %343 = vector.broadcast %342 : vector<16x1xf32> to vector<16x32xf32>
    %344 = arith.mulf %334, %343 : vector<16x32xf32>
    %345 = vector.broadcast %327 : vector<1x32xf32> to vector<16x32xf32>
    %346 = arith.mulf %344, %345 : vector<16x32xf32>
    %347 = vector.broadcast %328 : vector<1x32xf32> to vector<16x32xf32>
    %348 = arith.addf %346, %347 : vector<16x32xf32>
    %349 = vector.extract_strided_slice %348 {offsets = [0, 0], sizes = [1, 32], strides = [1, 1]} : vector<16x32xf32> to vector<1x32xf32>
    %350 = vector.extract_strided_slice %348 {offsets = [8, 0], sizes = [1, 32], strides = [1, 1]} : vector<16x32xf32> to vector<1x32xf32>
    %351 = tpu.concatenate %349, %350 in 0 : vector<1x32xf32>, vector<1x32xf32> -> vector<2x32xf32>
    %c0_137 = arith.constant 0 : index
    %c0_138 = arith.constant 0 : index
    %352 = vector.load %arg31[%c0_137, %c0_138] : memref<32x24xf32, #tpu.memory_space<vmem>>, vector<32x24xf32>
    %cst_139 = arith.constant dense<0.000000e+00> : vector<2x24xf32>
    %353 = tpu.matmul %351, %352, %cst_139 {dimension_numbers = #tpu.dot_dimension_numbers<[1], [0], [0], [1], [0, 0, 1, 1], [], []>} : vector<2x32xf32>, vector<32x24xf32>, vector<2x24xf32> -> vector<2x24xf32>
    %c0_140 = arith.constant 0 : index
    %c0_141 = arith.constant 0 : index
    %354 = vector.load %arg32[%c0_140, %c0_141] : memref<1x24xf32, #tpu.memory_space<vmem>>, vector<1x24xf32>
    %355 = vector.broadcast %354 : vector<1x24xf32> to vector<2x24xf32>
    %356 = arith.addf %353, %355 : vector<2x24xf32>
    %cst_142 = arith.constant 0.000000e+00 : f32
    %357 = vector.broadcast %cst_142 : f32 to vector<2x24xf32>
    %358 = arith.maximumf %356, %357 : vector<2x24xf32>
    %c0_143 = arith.constant 0 : index
    %c0_144 = arith.constant 0 : index
    %359 = vector.load %arg33[%c0_143, %c0_144] : memref<24x20xf32, #tpu.memory_space<vmem>>, vector<24x20xf32>
    %cst_145 = arith.constant dense<0.000000e+00> : vector<2x20xf32>
    %360 = tpu.matmul %358, %359, %cst_145 {dimension_numbers = #tpu.dot_dimension_numbers<[1], [0], [0], [1], [0, 0, 1, 1], [], []>} : vector<2x24xf32>, vector<24x20xf32>, vector<2x20xf32> -> vector<2x20xf32>
    %c0_146 = arith.constant 0 : index
    %c0_147 = arith.constant 0 : index
    %361 = vector.load %arg34[%c0_146, %c0_147] : memref<1x20xf32, #tpu.memory_space<vmem>>, vector<1x20xf32>
    %362 = vector.broadcast %361 : vector<1x20xf32> to vector<2x20xf32>
    %363 = arith.addf %360, %362 : vector<2x20xf32>
    %cst_148 = arith.constant 0.000000e+00 : f32
    %364 = vector.broadcast %cst_148 : f32 to vector<2x20xf32>
    %365 = arith.maximumf %363, %364 : vector<2x20xf32>
    %c0_149 = arith.constant 0 : index
    %c0_150 = arith.constant 0 : index
    %366 = vector.load %arg35[%c0_149, %c0_150] : memref<20x14xf32, #tpu.memory_space<vmem>>, vector<20x14xf32>
    %cst_151 = arith.constant dense<0.000000e+00> : vector<2x14xf32>
    %367 = tpu.matmul %365, %366, %cst_151 {dimension_numbers = #tpu.dot_dimension_numbers<[1], [0], [0], [1], [0, 0, 1, 1], [], []>} : vector<2x20xf32>, vector<20x14xf32>, vector<2x14xf32> -> vector<2x14xf32>
    %c0_152 = arith.constant 0 : index
    %c0_153 = arith.constant 0 : index
    %368 = vector.load %arg36[%c0_152, %c0_153] : memref<1x14xf32, #tpu.memory_space<vmem>>, vector<1x14xf32>
    %369 = vector.broadcast %368 : vector<1x14xf32> to vector<2x14xf32>
    %370 = arith.addf %367, %369 : vector<2x14xf32>
    %cst_154 = arith.constant dense<0xFF800000> : vector<2xf32>
    %371 = vector.multi_reduction <maximumf>, %370, %cst_154 [1] : vector<2x14xf32> to vector<2xf32>
    %372 = vector.shape_cast %371 : vector<2xf32> to vector<2x1xf32>
    %373 = vector.broadcast %372 : vector<2x1xf32> to vector<2x14xf32>
    %374 = arith.subf %370, %373 : vector<2x14xf32>
    %375 = math.exp %374 : vector<2x14xf32>
    %cst_155 = arith.constant dense<0.000000e+00> : vector<2xf32>
    %376 = vector.multi_reduction <add>, %375, %cst_155 [1] : vector<2x14xf32> to vector<2xf32>
    %377 = vector.shape_cast %376 : vector<2xf32> to vector<2x1xf32>
    %378 = math.log %377 : vector<2x1xf32>
    %379 = vector.broadcast %378 : vector<2x1xf32> to vector<2x14xf32>
    %380 = arith.subf %374, %379 : vector<2x14xf32>
    %c0_156 = arith.constant 0 : index
    %c0_157 = arith.constant 0 : index
    %381 = vector.load %arg37[%c0_156, %c0_157] : memref<2x14xf32, #tpu.memory_space<vmem>>, vector<2x14xf32>
    tpu.vector_store %arg37[%c0_156, %c0_157], %380 {strides = array<i32>} : memref<2x14xf32, #tpu.memory_space<vmem>>, vector<2x14xf32>,
    return
  }
}

</mosaic_0001>

<bundles_post_ra>
// kernel: tile.0
= control target key start
LH: loop header
LB: loop body
LE: loop exit
PB: predicated region body
PF: predicated region fallthrough
CT: control target
= control target key end

     0   :  { %s66_s8 = smov 125   ;;  %vm7_vm0 = vcmask 7168   ;;  %s67_s11 = smov 126   ;;  %s117_s0 = inlined_call_operand.vmem [shape: s32[2,8], index: 0, kind: input, shape index: {}]   ;;  %s118_s1 = inlined_call_operand.vmem [shape: s32[16,1], index: 1, kind: output, shape index: {}]  }
   0x1   :  { %v4_v0 = vld [vmem:[%s117_s0] sm:$0x3]  ;;  %s65_s0 = smov 127   ;;  %s68_s12 = smov 124  }
   0x2   :  { %5 = vst [vmem:[#allocation0] sm:$0x3] %v4_v0  ;;  %s69_s13 = smov 123   ;;  %s70_s14 = smov 122  }
   0x3   :  { %s71_s15 = smov 121  }
   0x9   :  { %v9_v1 = vld [vmem:[#allocation0] sm:$0x3]  }
   0xa   :  { %v21_v2 = vld [vmem:[#allocation0] sm:$0x3]   ;;  %10 = vrot.lane.b32.xlu0 %v9_v1, %s65_s0 }
   0xb   :  { %22 = vrot.lane.b32.xlu1 %v21_v2, %s66_s8  ;;  %v15_v3 = vld [vmem:[#allocation0] sm:$0x3]  }
   0xc   :  { %v27_v4 = vld [vmem:[#allocation0] sm:$0x3]  }
   0xd   :  { %v6_v5 = vld [vmem:[#allocation0] sm:$0x3]  }
   0xe   :  { %8 = vst.msk [vmem:[%s118_s1] ss:$8 sm:$0x3] %vm7_vm0, %v6_v5   ;;  %16 = vrot.lane.b32.xlu0 %v15_v3, %s67_s11  ;;  %v33_v6 = vld [vmem:[#allocation0] sm:$0x3]  }
   0xf   :  { %28 = vrot.lane.b32.xlu1 %v27_v4, %s68_s12  ;;  %v39_v7 = vld [vmem:[#allocation0] sm:$0x3]  }
  0x10   :  { %v45_v8 = vld [vmem:[#allocation0] sm:$0x3]  }
  0x12   :  { %34 = vrot.lane.b32.xlu0 %v33_v6, %s69_s13 }
  0x13   :  { %40 = vrot.lane.b32.xlu1 %v39_v7, %s70_s14 }
  0x16   :  { %46 = vrot.lane.b32.xlu0 %v45_v8, %s71_s15 }
  0x7c   :  { %v11_v9 = vpop.permute.xlu0 %10  }
  0x7d   :  { %v23_v10 = vpop.permute.xlu1 %22   ;;  %51 = vst.msk [vmem:[%s118_s1 + $0x1] ss:$8 sm:$0x3] %vm7_vm0, %v11_v9  }
  0x7e   :  { %53 = vst.msk [vmem:[%s118_s1 + $0x3] ss:$8 sm:$0x3] %vm7_vm0, %v23_v10  }
  0x80   :  { %v17_v11 = vpop.permute.xlu0 %16  }
  0x81   :  { %v29_v12 = vpop.permute.xlu1 %28   ;;  %52 = vst.msk [vmem:[%s118_s1 + $0x2] ss:$8 sm:$0x3] %vm7_vm0, %v17_v11  }
  0x82   :  { %54 = vst.msk [vmem:[%s118_s1 + $0x4] ss:$8 sm:$0x3] %vm7_vm0, %v29_v12  }
  0x84   :  { %v35_v13 = vpop.permute.xlu0 %34  }
  0x85   :  { %v41_v14 = vpop.permute.xlu1 %40   ;;  %55 = vst.msk [vmem:[%s118_s1 + $0x5] ss:$8 sm:$0x3] %vm7_vm0, %v35_v13  }
  0x86   :  { %56 = vst.msk [vmem:[%s118_s1 + $0x6] ss:$8 sm:$0x3] %vm7_vm0, %v41_v14  }
  0x88   :  { %v47_v15 = vpop.permute.xlu0 %46  }
  0x89   :  { %57 = vst.msk [vmem:[%s118_s1 + $0x7] ss:$8 sm:$0x3] %vm7_vm0, %v47_v15  }

// kernel: forward.1
= control target key start
LH: loop header
LB: loop body
LE: loop exit
PB: predicated region body
PF: predicated region fallthrough
CT: control target
= control target key end

     0   :  { %s3768_s6 = smov 1   ;;  %s3769_s10 = smov 2   ;;  %s4343_s0 = inlined_call_operand.smem [shape: u32[38], index: -1, kind: input, shape index: {}] }
   0x1   :  { %s3825_s5 = sld [smem:[%s4343_s0]]   ;;  %s3770_s14 = smov 3  }
   0x2   :  { %s3830_s9 = sld [smem:[%s4343_s0 + %s3768_s6]]   ;;  %s3771_s18 = smov 4  }
   0x3   :  { %s3835_s13 = sld [smem:[%s4343_s0 + %s3769_s10]]   ;;  %s3772_s22 = smov 5  }
   0x4   :  { %s3840_s17 = sld [smem:[%s4343_s0 + %s3770_s14]]   ;;  %s3773_s26 = smov 6  }
   0x5   :  { %s3845_s21 = sld [smem:[%s4343_s0 + %s3771_s18]]   ;;  %s3774_s30 = smov 7  }
   0x6   :  { %s3850_s25 = sld [smem:[%s4343_s0 + %s3772_s22]]   ;;  %s3775_s4 = smov 8  }
   0x7   :  { %s3855_s29 = sld [smem:[%s4343_s0 + %s3773_s26]]   ;;  %s3776_s10 = smov 9  }
   0x8   :  { %s3860_s3 = sld [smem:[%s4343_s0 + %s3774_s30]]   ;;  %s3777_s15 = smov 10  }
   0x9   :  { %s3865_s8 = sld [smem:[%s4343_s0 + %s3775_s4]]   ;;  %s3778_s20 = smov 11  }
   0xa   :  { %s3870_s14 = sld [smem:[%s4343_s0 + %s3776_s10]]   ;;  %s3779_s26 = smov 12  }
   0xb   :  { %s3875_s19 = sld [smem:[%s4343_s0 + %s3777_s15]]   ;;  %s3780_s1 = smov 13  }
   0xc   :  { %s3880_s24 = sld [smem:[%s4343_s0 + %s3778_s20]]   ;;  %s3781_s7 = smov 14  }
   0xd   :  { %s3885_s30 = sld [smem:[%s4343_s0 + %s3779_s26]]   ;;  %s3782_s15 = smov 15  }
   0xe   :  { %s3890_s6 = sld [smem:[%s4343_s0 + %s3780_s1]]   ;;  %s3783_s22 = smov 16  }
   0xf   :  { %s3895_s12 = sld [smem:[%s4343_s0 + %s3781_s7]]   ;;  %s3784_s28 = smov 17  }
  0x10   :  { %s3900_s20 = sld [smem:[%s4343_s0 + %s3782_s15]]   ;;  %s3785_s7 = smov 18  }
  0x11   :  { %s3905_s27 = sld [smem:[%s4343_s0 + %s3783_s22]]   ;;  %s3786_s15 = smov 19  }
  0x12   :  { %s3910_s4 = sld [smem:[%s4343_s0 + %s3784_s28]]   ;;  %s3787_s22 = smov 20  }
  0x13   :  { %s3788_s28 = smov 21  }
  0x15   :  { %4351 = sst [smem:[#allocation5_spill]] %s3895_s12 }
  0x16   :  { %4352 = sst [smem:[#allocation6_spill]] %s3900_s20 }
  0x17   :  { %4353 = sst [smem:[#allocation7_spill]] %s3905_s27 }
  0x18   :  { %4354 = sst [smem:[#allocation8_spill]] %s3910_s4 }
  0x19   :  { %s3915_s12 = sld [smem:[%s4343_s0 + %s3785_s7]]   ;;  %s3789_s7 = smov 22  }
  0x1a   :  { %s3920_s20 = sld [smem:[%s4343_s0 + %s3786_s15]]   ;;  %s3790_s15 = smov 23  }
  0x1b   :  { %s3925_s27 = sld [smem:[%s4343_s0 + %s3787_s22]]   ;;  %s3791_s22 = smov 24  }
  0x1c   :  { %s3930_s4 = sld [smem:[%s4343_s0 + %s3788_s28]]   ;;  %s3792_s28 = smov 25  }
  0x1f   :  { %4355 = sst [smem:[#allocation9_spill]] %s3915_s12 }
  0x20   :  { %4356 = sst [smem:[#allocation10_spill]] %s3920_s20 }
  0x21   :  { %4357 = sst [smem:[#allocation11_spill]] %s3925_s27 }
  0x22   :  { %4358 = sst [smem:[#allocation12_spill]] %s3930_s4 }
  0x23   :  { %s3935_s12 = sld [smem:[%s4343_s0 + %s3789_s7]]   ;;  %s3793_s7 = smov 26  }
  0x24   :  { %s3940_s20 = sld [smem:[%s4343_s0 + %s3790_s15]]   ;;  %s3794_s15 = smov 27  }
  0x25   :  { %s3945_s27 = sld [smem:[%s4343_s0 + %s3791_s22]]   ;;  %s3795_s22 = smov 28  }
  0x26   :  { %s3950_s4 = sld [smem:[%s4343_s0 + %s3792_s28]]   ;;  %s3796_s28 = smov 29  }
  0x29   :  { %4359 = sst [smem:[#allocation13_spill]] %s3935_s12 }
  0x2a   :  { %4360 = sst [smem:[#allocation14_spill]] %s3940_s20 }
  0x2b   :  { %4361 = sst [smem:[#allocation15_spill]] %s3945_s27 }
  0x2c   :  { %4362 = sst [smem:[#allocation16_spill]] %s3950_s4 }
  0x2d   :  { %s3955_s12 = sld [smem:[%s4343_s0 + %s3793_s7]]   ;;  %s3797_s7 = smov 30  }
  0x2e   :  { %s3960_s20 = sld [smem:[%s4343_s0 + %s3794_s15]]   ;;  %s3798_s15 = smov 31  }
  0x2f   :  { %s3965_s27 = sld [smem:[%s4343_s0 + %s3795_s22]]   ;;  %s3799_s22 = smov 32  }
  0x30   :  { %s3970_s4 = sld [smem:[%s4343_s0 + %s3796_s28]]   ;;  %s3800_s28 = smov 33  }
  0x33   :  { %4363 = sst [smem:[#allocation17_spill]] %s3955_s12 }
  0x34   :  { %4364 = sst [smem:[#allocation18_spill]] %s3960_s20 }
  0x35   :  { %4365 = sst [smem:[#allocation19_spill]] %s3965_s27 }
  0x36   :  { %4366 = sst [smem:[#allocation20_spill]] %s3970_s4 }
  0x37   :  { %s3975_s12 = sld [smem:[%s4343_s0 + %s3797_s7]]   ;;  %s3801_s7 = smov 34  }
  0x38   :  { %s3980_s20 = sld [smem:[%s4343_s0 + %s3798_s15]]   ;;  %s3802_s15 = smov 35  }
  0x39   :  { %s3985_s27 = sld [smem:[%s4343_s0 + %s3799_s22]]   ;;  %s3803_s22 = smov 36  }
  0x3a   :  { %s3990_s4 = sld [smem:[%s4343_s0 + %s3800_s28]]   ;;  %s3804_s28 = smov 37  }
  0x3d   :  { %4367 = sst [smem:[#allocation21_spill]] %s3975_s12 }
  0x3e   :  { %4368 = sst [smem:[#allocation22_spill]] %s3980_s20 }
  0x3f   :  { %4369 = sst [smem:[#allocation23_spill]] %s3985_s27 }
  0x40   :  { %4370 = sst [smem:[#allocation24_spill]] %s3990_s4 }
  0x41   :  { %s3995_s12 = sld [smem:[%s4343_s0 + %s3801_s7]]  }
  0x42   :  { %s4000_s20 = sld [smem:[%s4343_s0 + %s3802_s15]]  }
  0x43   :  { %s4005_s27 = sld [smem:[%s4343_s0 + %s3803_s22]]  }
  0x44   :  { %s4010_s4 = sld [smem:[%s4343_s0 + %s3804_s28]]  }
  0x45   :  { %v157_v0 = vld [vmem:[%s3830_s9] sm:$0xff]  ;;  %v3805_v2 = vmov 0   ;;  %v202_v4 = vld [vmem:[%s3845_s21 + $0x8] sm:$0xff] }
  0x46   :  { %v155_v1 = vld [vmem:[%s3825_s5] sm:$0xff]  ;;  %3678 = vset.pattern.permute.xlu0 %v3805_v2  ;;  %3679 = vset.pattern.permute.xlu1 %v3805_v2 }
  0x47   :  { %v201_v3 = vld [vmem:[%s3845_s21] sm:$0xff]  ;;  %174 = vperm.xlu0 %3678, %v157_v0   ;;  %162 = vperm.xlu1 %3679, %v155_v1  }
  0x48   :  { %v3499_v5 = vpack.c.bf16 %v202_v4, %v201_v3 }
  0x49   :  { %80 = vsyncpa [#allocation3], 0  ;;  %v158_v6 = vld [vmem:[%s3830_s9 + $0x8] sm:$0xff]  ;;  %v185_v8 = vld [vmem:[%s3840_s17] sm:$0xff]  ;;  %v159_v11 = vlaneseq  ;;  %vm203_vm0 = vcmask 130048   ;;  %v3806_v14 = vmov 0.0  }
  0x4a   :  { %v156_v7 = vld [vmem:[%s3825_s5 + $0x8] sm:$0xff]  ;;  %3500 = vmatprep.subr.bf16.mxu0 %v3499_v5  ;;  %v187_v16 = vld [vmem:[%s3840_s17 + $0x10] sm:$0xff]  ;;  %v188_v17 = vld [vmem:[%s3840_s17 + $0x18] sm:$0xff]  ;;  %v3807_v24 = vmov 1.0   ;;  %vm362_vm5 = vcmask 261120   ;;  %vm3808_vm6 = vmmov 0  }
  0x4b   :  { %v186_v9 = vld [vmem:[%s3840_s17 + $0x8] sm:$0xff]  ;;  %3502 = vmatpush3.bf16.msra.mxu0 %v3499_v5  ;;  %177 = vperm.xlu0 %3678, %v158_v6   ;;  %v160_v12 = vand.u32 127, %v159_v11  ;;  %v3507_v20 = vpack.c.bf16 %v188_v17, %v187_v16  ;;  %v189_v22 = vld [vmem:[%s3840_s17 + $0x20] sm:$0xff]  ;;  %v191_v26 = vld [vmem:[%s3840_s17 + $0x30] sm:$0xff]  ;;  %s3809_s0 = smov 96   ;;  %s3810_s5 = smov 80  }
  0x4c   :  { %v3503_v10 = vpack.c.bf16 %v186_v9, %v185_v8  ;;  %165 = vperm.xlu1 %3679, %v156_v7   ;;  %v190_v23 = vld [vmem:[%s3840_s17 + $0x28] sm:$0xff]  ;;  %v192_v27 = vld [vmem:[%s3840_s17 + $0x38] sm:$0xff]  ;;  %v193_v29 = vld [vmem:[%s3840_s17 + $0x40] sm:$0xff]  ;;  %s3811_s9 = smov 112   ;;  %vm583_vm7 = vcmask 64512   ;;  %s3814_s21 = smov 16  }
  0x4d   :  { %v3511_v25 = vpack.c.bf16 %v190_v23, %v189_v22  ;;  %v3515_v28 = vpack.c.bf16 %v192_v27, %v191_v26  ;;  %v194_v30 = vld [vmem:[%s3840_s17 + $0x48] sm:$0xff]  ;;  %v195_v32 = vld [vmem:[%s3840_s17 + $0x50] sm:$0xff]  ;;  %v196_v33 = vld [vmem:[%s3840_s17 + $0x58] sm:$0xff]  ;;  %vm1442_vm8 = vcmask 523264   ;;  %s4380_s7 = sld [smem:[#allocation16_spill]]  ;;  %s4381_s10 = sld [smem:[#allocation14_spill]] }
  0x4e   :  { %3504 = vmatprep.subr.bf16.mxu0 %v3503_v10  ;;  %v3519_v31 = vpack.c.bf16 %v194_v30, %v193_v29  ;;  %v3523_v34 = vpack.c.bf16 %v196_v33, %v195_v32  ;;  %v197_v35 = vld [vmem:[%s3840_s17 + $0x60] sm:$0xff]  ;;  %v198_v36 = vld [vmem:[%s3840_s17 + $0x68] sm:$0xff]  ;;  %v199_v38 = vld [vmem:[%s3840_s17 + $0x70] sm:$0xff]  ;;  %s4382_s11 = sld [smem:[#allocation15_spill]]  ;;  %s4383_s15 = sld [smem:[#allocation18_spill]]  ;;  %vm2723_vm9 = vcmask 1040384  }
  0x4f   :  { %v3527_v37 = vpack.c.bf16 %v198_v36, %v197_v35  ;;  %v200_v39 = vld [vmem:[%s3840_s17 + $0x78] sm:$0xff]  ;;  %v410_v56 = vld [vmem:[%s3860_s3] sm:$0xff]  ;;  %v411_v57 = vld [vmem:[%s3860_s3 + $0x8] sm:$0xff]  ;;  %s3813_s17 = smov 48   ;;  %s4384_s16 = sld [smem:[#allocation17_spill]]  ;;  %vm2820_vm10 = vcmask 195584  }
  0x50   :  { %v3531_v40 = vpack.c.bf16 %v200_v39, %v199_v38  ;;  %v412_v58 = vld [vmem:[%s3860_s3 + $0x10] sm:$0xff]  ;;  %v3535_v59 = vpack.c.bf16 %v411_v57, %v410_v56  ;;  %v413_v60 = vld [vmem:[%s3860_s3 + $0x18] sm:$0xff]  ;;  %v3056_v5 = vld [vmem:[%s3850_s25] ss:$0 sm:$0xff]  ;;  %s4371_s25 = sld [smem:[#allocation6_spill]]  ;;  %s4373_s3 = sld [smem:[#allocation7_spill]] }
  0x51   :  { %v3539_v61 = vpack.c.bf16 %v413_v60, %v412_v58  ;;  %v3057_v7 = vld [vmem:[%s3855_s29] ss:$0 sm:$0xff]  ;;  %s4372_s29 = sld [smem:[#allocation5_spill]]  ;;  %s4385_s18 = sld [smem:[#allocation19_spill]]  ;;  %vm2909_vm11 = vcmask 1043456   ;;  %vm2905_vm12 = vcmask 162816  }
  0x52   :  { %3536 = vmatprep.subr.bf16.mxu1 %v3535_v59  ;;  %v3058_v16 = vld [vmem:[%s3865_s8] ss:$0 sm:$0xff]  ;;  %s4374_s8 = sld [smem:[#allocation10_spill]]  ;;  %s4386_s22 = sld [smem:[#allocation22_spill]]  ;;  %vm2983_vm13 = vcmask 107520  }
  0x53   :  { %3538 = vmatpush3.bf16.msra.mxu1 %v3535_v59  ;;  %v406_v22 = vld [vmem:[%s3835_s13] sm:$0x3]  ;;  %s3812_s13 = smov 64   ;;  %s4387_s23 = sld [smem:[#allocation20_spill]] }
  0x54   :  { %3540 = vmatprep.subr.bf16.mxu1 %v3539_v61  ;;  %v407_v23 = vcvt.s32.f32 %v406_v22  ;;  %s4388_s26 = sld [smem:[#allocation21_spill]]  ;;  %s4389_s28 = sld [smem:[#allocation24_spill]] }
  0x55   :  { %s4390_s1 = sld [smem:[#allocation23_spill]] }
  0x57   :  { %3542 = vmatpush3.bf16.msra.mxu1 %v3539_v61 }
  0x58   :  { %3297 = vmatprep.subr.mxu1 %v3806_v14 }
  0xc6   :  { %v175_v13 = vpop.permute.xlu0 %174  ;;  %v163_v19 = vpop.permute.xlu1 %162 }
  0xc7   :  { %vm179_vm1 = vcmp.eq.s32.totalorder %v160_v12, %v175_v13  ;;  %vm167_vm3 = vcmp.eq.s32.totalorder %v160_v12, %v163_v19 }
  0xc8   :  { %v3050_v15 = vsel %vm179_vm1, 1.0, %v3806_v14 }
  0xc9   :  { %3248 = vmatprep.mubr.msk.f32.mxu0 %vm203_vm0, %v3050_v15 }
  0xca   :  { %v178_v18 = vpop.permute.xlu0 %177 }
  0xcb   :  { %vm180_vm2 = vcmp.eq.s32.totalorder %v160_v12, %v178_v18  ;;  %v166_v41 = vpop.permute.xlu1 %165 }
  0xcc   :  { %v3051_v21 = vsel %vm180_vm2, 1.0, %v3806_v14  ;;  %vm168_vm4 = vcmp.eq.s32.totalorder %v160_v12, %v166_v41 }
  0xcd   :  { %3249 = vmatmul.mubr.msk.f32.vlgmr.msra.gmra.mrb[0].mxu0 %vm203_vm0, %v3051_v21 }
  0xce   :  { %3506 = vmatpush3.bf16.msra.mxu0 %v3503_v10  ;;  %3283 = vmatprep.mubr.msk.f32.mxu0 %vm167_vm3, %v3807_v24 }
  0xcf   :  { %3508 = vmatprep.subr.bf16.mxu0 %v3507_v20 }
  0xd2   :  { %3510 = vmatpush3.bf16.msra.mxu0 %v3507_v20 }
  0xd3   :  { %3512 = vmatprep.subr.bf16.mxu0 %v3511_v25 }
  0xd6   :  { %3514 = vmatpush3.bf16.msra.mxu0 %v3511_v25  ;;  %v4076_v25 = vshrl.u32 %v159_v11, 7 }
  0xd7   :  { %3516 = vmatprep.subr.bf16.mxu0 %v3515_v28 }
  0xd8   :  { %v504_v27 = vsub.s32 0, %v4076_v25  ;;  %v843_v59 = vsub.s32 1, %v4076_v25 }
  0xda   :  { %3518 = vmatpush3.bf16.msra.mxu0 %v3515_v28 }
  0xdb   :  { %3520 = vmatprep.subr.bf16.mxu0 %v3519_v31 }
  0xde   :  { %3522 = vmatpush3.bf16.msra.mxu0 %v3519_v31 }
  0xdf   :  { %3524 = vmatprep.subr.bf16.mxu0 %v3523_v34 }
  0xe2   :  { %3526 = vmatpush3.bf16.msra.mxu0 %v3523_v34 }
  0xe3   :  { %3528 = vmatprep.subr.bf16.mxu0 %v3527_v37 }
  0xe6   :  { %3530 = vmatpush3.bf16.msra.mxu0 %v3527_v37 }
  0xe7   :  { %3532 = vmatprep.subr.bf16.mxu0 %v3531_v40 }
  0xea   :  { %3534 = vmatpush3.bf16.msra.mxu0 %v3531_v40 }
  0xeb   :  { %3332 = vmatprep.subr.mxu0 %v3806_v14 }
  0xed   :  { %3284 = vmatmul.mubr.msk.f32.vlgmr.msra.gmra.mrb[0].mxu0 %vm168_vm4, %v3807_v24  ;;  %v408_v24 = vsub.f32 1.0, %v407_v23 }
  0xee   :  { %3334 = vmatprep.mubr.msk.f32.mxu0 %vm3808_vm6, %v3806_v14 }
  0xef   :  { %v4078_v26 = vmul.f32 -1e+09, %v408_v24 }
  0xf1   :  { %v4082_v28 = vrot.slane %v4078_v26, %v504_v27 }
 0x1c0   :  { %v3285_v42 = vpop.f32.mrb[0].mxu0 }
 0x1c1   :  { %v351_v43 = vpop.f32.mrb[1].mxu0  ;;  %v366_v44 = vsel %vm362_vm5, %v3285_v42, 0.0 }
 0x1c2   :  { %367 = vadd.xlane.f32.xlu1 %v366_v44  ;;  %v363_v45 = vsel %vm362_vm5, %v351_v43, 0.0 }
 0x1c3   :  { %364 = vadd.xlane.f32.xlu0 %v363_v45 }
 0x24f   :  { %v368_v46 = vpop.xlane.xlu1 %367 }
 0x250   :  { %v371_v47 = vmul.f32 0.03125, %v368_v46  ;;  %v365_v48 = vpop.xlane.xlu0 %364 }
 0x251   :  { %v370_v49 = vmul.f32 0.03125, %v365_v48 }
 0x252   :  { %v373_v50 = vsub.f32 %v3285_v42, %v371_v47 }
 0x253   :  { %v372_v51 = vsub.f32 %v351_v43, %v370_v49 }
 0x254   :  { %v375_v54 = vmul.f32 %v373_v50, %v373_v50 }
 0x255   :  { %v374_v52 = vmul.f32 %v372_v51, %v372_v51 }
 0x256   :  { %v379_v55 = vsel %vm362_vm5, %v375_v54, 0.0 }
 0x257   :  { %v376_v53 = vsel %vm362_vm5, %v374_v52, 0.0 }
 0x258   :  { %377 = vadd.xlane.f32.xlu0 %v376_v53 }
 0x25c   :  { %380 = vadd.xlane.f32.xlu0 %v379_v55 }
 0x2e5   :  { %v378_v62 = vpop.xlane.xlu0 %377 }
 0x2e6   :  { %v382_v63 = vmul.f32 0.03125, %v378_v62  ;;  %v4117_v62 = vrot.slane %v4078_v26, %v843_v59 }
 0x2e8   :  { %v384_v0 = vadd.f32 1e-12, %v382_v63 }
 0x2e9   :  { %v381_v1 = vpop.xlane.xlu0 %380 }
 0x2ea   :  { %3680 = vrsqrt.f32 %v384_v0  ;;  %v383_v2 = vmul.f32 0.03125, %v381_v1 }
 0x2ec   :  { %v385_v3 = vadd.f32 1e-12, %v383_v2 }
 0x2ee   :  { %3682 = vrsqrt.f32 %v385_v3 }
 0x2f4   :  { %v3681_v4 = vpop.eup %3680 }
 0x2f5   :  { %v388_v6 = vmul.f32 %v3681_v4, %v372_v51 }
 0x2f7   :  { %v396_v8 = vmul.f32 %v3056_v5, %v388_v6 }
 0x2f8   :  { %v3683_v9 = vpop.eup %3682 }
 0x2f9   :  { %v389_v10 = vmul.f32 %v3683_v9, %v373_v50  ;;  %v4051_v12 = vadd.f32 %v3057_v7, %v396_v8 }
 0x2fb   :  { %v397_v13 = vmul.f32 %v3056_v5, %v389_v10  ;;  %3294 = vmatprep.mubr.msk.f32.mxu1 %vm362_vm5, %v4051_v12 }
 0x2fd   :  { %v4055_v15 = vadd.f32 %v3057_v7, %v397_v13 }
 0x2ff   :  { %3295 = vmatmul.mubr.msk.f32.vlgmr.msra.gmra.mrb[0].mxu1 %vm362_vm5, %v4055_v15 }
 0x300   :  { %3299 = vmatprep.mubr.msk.f32.mxu1 %vm3808_vm6, %v3806_v14 }
 0x3d2   :  { %v3296_v17 = vpop.f32.mrb[0].mxu1 }
 0x3d3   :  { %v4064_v18 = vadd.f32 %v3296_v17, %v3058_v16  ;;  %v493_v19 = vpop.f32.mrb[1].mxu1 }
 0x3d4   :  { %v494_v20 = vadd.f32 %v3058_v16, %v493_v19 }
 0x3d6   :  { %507 = vrot.lane.b32.xlu1 %v494_v20, %s3809_s0 }
 0x3da   :  { %673 = vrot.lane.b32.xlu1 %v494_v20, %s3810_s5 }
 0x3de   :  { %671 = vrot.lane.b32.xlu1 %v494_v20, %s3811_s9 }
 0x448   :  { %v508_v21 = vpop.permute.xlu1 %507 }
 0x449   :  { %3298 = vmatpush3.xpose.msk.msra.mxu1 %vm203_vm0, %v508_v21 }
 0x44a   :  { %3302 = vmatprep.subr.mxu1 %v3806_v14 }
 0x44c   :  { %3300 = vmatmul.mubr.msk.f32.vlgmr.msra.gmra.mrb[2].mxu1 %vm203_vm0, %v494_v20  ;;  %v674_v40 = vpop.permute.xlu1 %673 }
 0x44d   :  { %3304 = vmatprep.mubr.msk.f32.mxu1 %vm3808_vm6, %v3806_v14 }
 0x450   :  { %v672_v42 = vpop.permute.xlu1 %671 }
 0x51f   :  { %v579_v29 = vpop.f32.mrb[2].mxu1 }
 0x520   :  { %v580_v30 = vadd.f32 %v579_v29, %v4082_v28  ;;  %v3301_v31 = vpop.f32.mrb[3].mxu1 }
 0x522   :  { %v584_v32 = vsel %vm583_vm7, %v580_v30, -inf }
 0x523   :  { %585 = vmax.xlane.f32.xlu0 %v584_v32 }
 0x5b0   :  { %v586_v33 = vpop.xlane.xlu0 %585 }
 0x5b1   :  { %v587_v34 = vsub.f32 %v580_v30, %v586_v33 }
 0x5b3   :  { %v588_v35 = vmul.f32 1.442695, %v587_v34 }
 0x5b5   :  { %3684 = vpow2.f32 %v588_v35 }
 0x5bf   :  { %v3685_v11 = vpop.eup %3684 }
 0x5c0   :  { %v590_v36 = vsel %vm583_vm7, %v3685_v11, 0.0 }
 0x5c1   :  { %591 = vadd.xlane.f32.xlu0 %v590_v36  ;;  %v1179_v36 = vld [vmem:[%s3870_s14] sm:$0xff] }
 0x5d7   :  { %595 = vrot.lane.b32.xlu0 %v494_v20, %s3812_s13 }
 0x64e   :  { %v592_v37 = vpop.xlane.xlu0 %591 }
 0x64f   :  { %3686 = vrcp.f32 %v592_v37  ;;  %v1180_v37 = vld [vmem:[%s3870_s14 + $0x8] sm:$0xff] }
 0x652   :  { %v596_v38 = vpop.permute.xlu0 %595 }
 0x653   :  { %3303 = vmatpush3.msra.mxu1 %v596_v38  ;;  %v1181_v38 = vld [vmem:[%s3870_s14 + $0x10] sm:$0xff] }
 0x654   :  { %3307 = vmatprep.subr.mxu1 %v3806_v14 }
 0x659   :  { %v3687_v39 = vpop.eup %3686 }
 0x65a   :  { %v594_v41 = vmul.f32 %v3687_v39, %v3685_v11  ;;  %v3543_v39 = vpack.c.bf16 %v1180_v37, %v1179_v36  ;;  %v1434_v36 = vld [vmem:[%s4371_s25 + $0x38] sm:$0xff] }
 0x65c   :  { %3305 = vmatmul.mubr.msk.f32.vlgmr.msra.gmra.mrb[4].mxu1 %vm583_vm7, %v594_v41 }
 0x65d   :  { %3308 = vmatpush3.xpose.msk.msra.mxu1 %vm203_vm0, %v674_v40  ;;  %3309 = vmatprep.mubr.msk.f32.mxu1 %vm3808_vm6, %v3806_v14  ;;  %v1182_v40 = vld [vmem:[%s3870_s14 + $0x18] sm:$0xff]  ;;  %s4375_s14 = sld [smem:[#allocation8_spill]] }
 0x65e   :  { %3312 = vmatprep.subr.mxu1 %v3806_v14  ;;  %v3547_v41 = vpack.c.bf16 %v1182_v40, %v1181_v38  ;;  %v3078_v38 = vld [vmem:[%s4372_s29] ss:$0 sm:$0xff] }
 0x660   :  { %3310 = vmatmul.mubr.msk.f32.vlgmr.msra.gmra.mrb[6].mxu1 %vm203_vm0, %v672_v42 }
 0x661   :  { %3314 = vmatprep.mubr.msk.f32.mxu1 %vm3808_vm6, %v3806_v14 }
 0x72f   :  { %v4097_v43 = vpop.f32.mrb[4].mxu1 }
 0x730   :  { %v3306_v44 = vpop.f32.mrb[5].mxu1 }
 0x733   :  { %v745_v45 = vpop.f32.mrb[6].mxu1 }
 0x734   :  { %v746_v46 = vadd.f32 %v745_v45, %v4082_v28  ;;  %v3311_v47 = vpop.f32.mrb[7].mxu1  ;;  %v3073_v45 = vld [vmem:[%s3875_s19] ss:$0 sm:$0xff]  ;;  %s4376_s19 = sld [smem:[#allocation9_spill]] }
 0x736   :  { %v749_v48 = vsel %vm583_vm7, %v746_v46, -inf }
 0x737   :  { %750 = vmax.xlane.f32.xlu1 %v749_v48 }
 0x748   :  { %760 = vrot.lane.b32.xlu1 %v494_v20, %s3813_s17 }
 0x7c4   :  { %v751_v49 = vpop.xlane.xlu1 %750 }
 0x7c5   :  { %v752_v50 = vsub.f32 %v746_v46, %v751_v49 }
 0x7c7   :  { %v753_v51 = vmul.f32 1.442695, %v752_v50 }
 0x7c8   :  { %v761_v52 = vpop.permute.xlu1 %760 }
 0x7c9   :  { %3688 = vpow2.f32 %v753_v51  ;;  %3313 = vmatpush3.msra.mxu1 %v761_v52 }
 0x7ca   :  { %3317 = vmatprep.subr.mxu1 %v3806_v14 }
 0x7d3   :  { %v3689_v53 = vpop.eup %3688 }
 0x7d4   :  { %v755_v54 = vsel %vm583_vm7, %v3689_v53, 0.0 }
 0x7d5   :  { %756 = vadd.xlane.f32.xlu0 %v755_v54 }
 0x7eb   :  { %846 = vrot.lane.b32.xlu0 %v4064_v18, %s3809_s0 }
 0x862   :  { %v757_v55 = vpop.xlane.xlu0 %756 }
 0x863   :  { %3690 = vrcp.f32 %v757_v55 }
 0x866   :  { %v847_v58 = vpop.permute.xlu0 %846 }
 0x86d   :  { %v3691_v56 = vpop.eup %3690 }
 0x86e   :  { %v759_v57 = vmul.f32 %v3691_v56, %v3689_v53 }
 0x870   :  { %3315 = vmatmul.mubr.msk.f32.vlgmr.msra.gmra.mrb[8].mxu1 %vm583_vm7, %v759_v57 }
 0x871   :  { %3318 = vmatpush3.xpose.msk.msra.mxu1 %vm203_vm0, %v847_v58  ;;  %3319 = vmatprep.mubr.msk.f32.mxu1 %vm3808_vm6, %v3806_v14 }
 0x872   :  { %3322 = vmatprep.subr.mxu1 %v3806_v14 }
 0x874   :  { %3320 = vmatmul.mubr.msk.f32.vlgmr.msra.gmra.mrb[10].mxu1 %vm203_vm0, %v4064_v18 }
 0x875   :  { %3324 = vmatprep.mubr.msk.f32.mxu1 %vm3808_vm6, %v3806_v14 }
 0x943   :  { %v832_v60 = vpop.f32.mrb[8].mxu1 }
 0x944   :  { %v3316_v61 = vpop.f32.mrb[9].mxu1 }
 0x947   :  { %v918_v63 = vpop.f32.mrb[10].mxu1 }
 0x948   :  { %v919_v0 = vadd.f32 %v918_v63, %v4117_v62  ;;  %v3321_v1 = vpop.f32.mrb[11].mxu1  ;;  %v1317_v63 = vld [vmem:[%s3890_s6] sm:$0xff] }
 0x94a   :  { %v922_v2 = vsel %vm583_vm7, %v919_v0, -inf }
 0x94b   :  { %923 = vmax.xlane.f32.xlu1 %v922_v2  ;;  %v1319_v2 = vld [vmem:[%s3890_s6 + $0x10] sm:$0xff] }
 0x95c   :  { %933 = vrot.lane.b32.xlu1 %v4064_v18, %s3812_s13 }
 0x960   :  { %1009 = vrot.lane.b32.xlu1 %v4064_v18, %s3811_s9 }
 0x9d8   :  { %v924_v3 = vpop.xlane.xlu1 %923 }
 0x9d9   :  { %v925_v4 = vsub.f32 %v919_v0, %v924_v3  ;;  %v1318_v0 = vld [vmem:[%s3890_s6 + $0x8] sm:$0xff]  ;;  %v1320_v3 = vld [vmem:[%s3890_s6 + $0x18] sm:$0xff]  ;;  %s4379_s6 = sld [smem:[#allocation13_spill]] }
 0x9da   :  { %v3551_v1 = vpack.c.bf16 %v1318_v0, %v1317_v63 }
 0x9db   :  { %v926_v5 = vmul.f32 1.442695, %v925_v4  ;;  %v3555_v4 = vpack.c.bf16 %v1320_v3, %v1319_v2 }
 0x9dc   :  { %v934_v6 = vpop.permute.xlu1 %933 }
 0x9dd   :  { %3692 = vpow2.f32 %v926_v5  ;;  %3323 = vmatpush3.msra.mxu1 %v934_v6 }
 0x9de   :  { %3327 = vmatprep.subr.mxu1 %v3806_v14 }
 0x9e0   :  { %v1010_v17 = vpop.permute.xlu1 %1009 }
 0x9e7   :  { %v3693_v7 = vpop.eup %3692 }
 0x9e8   :  { %v928_v8 = vsel %vm583_vm7, %v3693_v7, 0.0 }
 0x9e9   :  { %929 = vadd.xlane.f32.xlu0 %v928_v8 }
 0x9ff   :  { %1011 = vrot.lane.b32.xlu0 %v4064_v18, %s3810_s5 }
 0xa76   :  { %v930_v9 = vpop.xlane.xlu0 %929 }
 0xa77   :  { %3694 = vrcp.f32 %v930_v9 }
 0xa7a   :  { %v1012_v16 = vpop.permute.xlu0 %1011 }
 0xa81   :  { %v3695_v10 = vpop.eup %3694 }
 0xa82   :  { %v932_v13 = vmul.f32 %v3695_v10, %v3693_v7 }
 0xa84   :  { %3325 = vmatmul.mubr.msk.f32.vlgmr.msra.gmra.mrb[12].mxu1 %vm583_vm7, %v932_v13 }
 0xa85   :  { %3328 = vmatpush3.xpose.msk.msra.mxu1 %vm203_vm0, %v1012_v16  ;;  %3329 = vmatprep.mubr.msk.f32.mxu1 %vm3808_vm6, %v3806_v14  ;;  %v3076_v16 = vld [vmem:[%s3880_s24] ss:$0 sm:$0xff]  ;;  %s4377_s24 = sld [smem:[#allocation11_spill]] }
 0xa86   :  { %3544 = vmatprep.subr.bf16.mxu1 %v3543_v39 }
 0xa88   :  { %3330 = vmatmul.mubr.msk.f32.vlgmr.msra.gmra.mrb[14].mxu1 %vm203_vm0, %v1010_v17 }
 0xa89   :  { %3546 = vmatpush3.bf16.msra.mxu1 %v3543_v39 }
 0xa8a   :  { %3548 = vmatprep.subr.bf16.mxu1 %v3547_v41 }
 0xa8d   :  { %3550 = vmatpush3.bf16.msra.mxu1 %v3547_v41 }
 0xb57   :  { %v1005_v19 = vpop.f32.mrb[12].mxu1 }
 0xb58   :  { %v3326_v20 = vpop.f32.mrb[13].mxu1 }
 0xb5b   :  { %v1083_v21 = vpop.f32.mrb[14].mxu1 }
 0xb5c   :  { %v1084_v22 = vadd.f32 %v1083_v21, %v4117_v62  ;;  %v3331_v23 = vpop.f32.mrb[15].mxu1 }
 0xb5e   :  { %v1087_v24 = vsel %vm583_vm7, %v1084_v22, -inf }
 0xb5f   :  { %1088 = vmax.xlane.f32.xlu1 %v1087_v24 }
 0xb70   :  { %837 = vrot.lane.b32.xlu1 %v832_v60, %s3814_s21 }
 0xbec   :  { %v1089_v25 = vpop.xlane.xlu1 %1088 }
 0xbed   :  { %v1090_v26 = vsub.f32 %v1084_v22, %v1089_v25 }
 0xbef   :  { %v1091_v27 = vmul.f32 1.442695, %v1090_v26  ;;  %v1427_v26 = vld [vmem:[%s4371_s25] sm:$0xff] }
 0xbf0   :  { %v838_v29 = vpop.permute.xlu1 %837 }
 0xbf1   :  { %3696 = vpow2.f32 %v1091_v27  ;;  %v840_v30 = vsel %vm203_vm0, %v4097_v43, %v838_v29  ;;  %v1428_v27 = vld [vmem:[%s4371_s25 + $0x8] sm:$0xff] }
 0xbf2   :  { %3345 = vmatprep.mubr.msk.f32.mxu1 %vm362_vm5, %v840_v30  ;;  %v3559_v29 = vpack.c.bf16 %v1428_v27, %v1427_v26  ;;  %v1429_v30 = vld [vmem:[%s4371_s25 + $0x10] sm:$0xff] }
 0xbf4   :  { %3560 = vmatprep.subr.bf16.mxu1 %v3559_v29 }
 0xbfb   :  { %v3697_v31 = vpop.eup %3696 }
 0xbfc   :  { %v1093_v32 = vsel %vm583_vm7, %v3697_v31, 0.0 }
 0xbfd   :  { %1094 = vadd.xlane.f32.xlu0 %v1093_v32 }
 0xc13   :  { %1098 = vrot.lane.b32.xlu0 %v4064_v18, %s3813_s17 }
 0xc8a   :  { %v1095_v33 = vpop.xlane.xlu0 %1094 }
 0xc8b   :  { %3698 = vrcp.f32 %v1095_v33  ;;  %v1431_v33 = vld [vmem:[%s4371_s25 + $0x20] sm:$0xff] }
 0xc8e   :  { %v1099_v34 = vpop.permute.xlu0 %1098 }
 0xc8f   :  { %3333 = vmatpush3.msra.mxu0 %v1099_v34  ;;  %v1432_v34 = vld [vmem:[%s4371_s25 + $0x28] sm:$0xff] }
 0xc90   :  { %3552 = vmatprep.subr.bf16.mxu0 %v3551_v1 }
 0xc95   :  { %v3699_v35 = vpop.eup %3698 }
 0xc96   :  { %v1097_v11 = vmul.f32 %v3699_v35, %v3697_v31  ;;  %v1430_v31 = vld [vmem:[%s4371_s25 + $0x18] sm:$0xff]  ;;  %v3567_v35 = vpack.c.bf16 %v1432_v34, %v1431_v33  ;;  %v3084_v33 = vld [vmem:[%s4375_s14] ss:$0 sm:$0xff] }
 0xc97   :  { %v3563_v32 = vpack.c.bf16 %v1430_v31, %v1429_v30 }
 0xc98   :  { %3335 = vmatmul.mubr.msk.f32.vlgmr.msra.gmra.mrb[2].mxu0 %vm583_vm7, %v1097_v11  ;;  %v1433_v11 = vld [vmem:[%s4371_s25 + $0x30] sm:$0xff] }
 0xc99   :  { %3554 = vmatpush3.bf16.msra.mxu0 %v3551_v1  ;;  %v3571_v37 = vpack.c.bf16 %v1434_v36, %v1433_v11  ;;  %v3085_v36 = vld [vmem:[%s4376_s19] ss:$0 sm:$0xff] }
 0xc9a   :  { %3556 = vmatprep.subr.bf16.mxu0 %v3555_v4 }
 0xc9d   :  { %3558 = vmatpush3.bf16.msra.mxu0 %v3555_v4 }
 0xd6b   :  { %v1170_v18 = vpop.f32.mrb[2].mxu0 }
 0xd6c   :  { %1175 = vrot.lane.b32.xlu1 %v1170_v18, %s3814_s21  ;;  %v3336_v42 = vpop.f32.mrb[3].mxu0 }
 0xdde   :  { %v1176_v43 = vpop.permute.xlu1 %1175 }
 0xddf   :  { %v1178_v44 = vsel %vm203_vm0, %v1005_v19, %v1176_v43  ;;  %v3077_v19 = vld [vmem:[%s3885_s30] ss:$0 sm:$0xff]  ;;  %s4378_s30 = sld [smem:[#allocation12_spill]] }
 0xde0   :  { %3346 = vmatmul.mubr.msk.f32.vlgmr.msra.gmra.mrb[16].mxu1 %vm362_vm5, %v1178_v44 }
 0xde1   :  { %3562 = vmatpush3.bf16.msra.mxu1 %v3559_v29 }
 0xde2   :  { %3564 = vmatprep.subr.bf16.mxu1 %v3563_v32 }
 0xde5   :  { %3566 = vmatpush3.bf16.msra.mxu1 %v3563_v32 }
 0xde6   :  { %3568 = vmatprep.subr.bf16.mxu1 %v3567_v35 }
 0xde9   :  { %3570 = vmatpush3.bf16.msra.mxu1 %v3567_v35 }
 0xdea   :  { %3572 = vmatprep.subr.bf16.mxu1 %v3571_v37 }
 0xded   :  { %3574 = vmatpush3.bf16.msra.mxu1 %v3571_v37 }
 0xdee   :  { %3399 = vmatprep.subr.mxu1 %v3806_v14 }
 0xeb3   :  { %v3347_v46 = vpop.f32.mrb[16].mxu1 }
 0xeb4   :  { %v1268_v47 = vadd.f32 %v3347_v46, %v3073_v45  ;;  %v1262_v48 = vpop.f32.mrb[17].mxu1 }
 0xeb5   :  { %v1263_v49 = vadd.f32 %v3073_v45, %v1262_v48 }
 0xeb6   :  { %v1272_v50 = vadd.f32 %v1268_v47, %v4055_v15 }
 0xeb7   :  { %v1271_v51 = vadd.f32 %v1263_v49, %v4051_v12 }
 0xeb8   :  { %v1278_v52 = vsel %vm362_vm5, %v1272_v50, 0.0 }
 0xeb9   :  { %1279 = vadd.xlane.f32.xlu1 %v1278_v52  ;;  %v1275_v53 = vsel %vm362_vm5, %v1271_v51, 0.0 }
 0xeba   :  { %1276 = vadd.xlane.f32.xlu0 %v1275_v53 }
 0xf46   :  { %v1280_v54 = vpop.xlane.xlu1 %1279 }
 0xf47   :  { %v1282_v55 = vmul.f32 0.03125, %v1280_v54  ;;  %v1277_v56 = vpop.xlane.xlu0 %1276 }
 0xf48   :  { %v1281_v57 = vmul.f32 0.03125, %v1277_v56 }
 0xf49   :  { %v1284_v58 = vsub.f32 %v1272_v50, %v1282_v55 }
 0xf4a   :  { %v1283_v59 = vsub.f32 %v1271_v51, %v1281_v57 }
 0xf4b   :  { %v1286_v12 = vmul.f32 %v1284_v58, %v1284_v58 }
 0xf4c   :  { %v1285_v60 = vmul.f32 %v1283_v59, %v1283_v59 }
 0xf4d   :  { %v1290_v61 = vsel %vm362_vm5, %v1286_v12, 0.0 }
 0xf4e   :  { %v1287_v15 = vsel %vm362_vm5, %v1285_v60, 0.0  ;;  %v3081_v60 = vld [vmem:[%s4373_s3] ss:$0 sm:$0xff] }
 0xf4f   :  { %1288 = vadd.xlane.f32.xlu0 %v1287_v15 }
 0xf53   :  { %1291 = vadd.xlane.f32.xlu0 %v1290_v61 }
 0xfdc   :  { %v1289_v5 = vpop.xlane.xlu0 %1288 }
 0xfdd   :  { %v1293_v6 = vmul.f32 0.03125, %v1289_v5 }
 0xfdf   :  { %v1295_v7 = vadd.f32 1e-12, %v1293_v6 }
 0xfe0   :  { %v1292_v8 = vpop.xlane.xlu0 %1291 }
 0xfe1   :  { %3700 = vrsqrt.f32 %v1295_v7  ;;  %v1294_v9 = vmul.f32 0.03125, %v1292_v8 }
 0xfe3   :  { %v1296_v10 = vadd.f32 1e-12, %v1294_v9 }
 0xfe5   :  { %3702 = vrsqrt.f32 %v1296_v10 }
 0xfeb   :  { %v3701_v13 = vpop.eup %3700 }
 0xfec   :  { %v1299_v17 = vmul.f32 %v3701_v13, %v1283_v59 }
 0xfee   :  { %v1307_v20 = vmul.f32 %v3076_v16, %v1299_v17 }
 0xfef   :  { %v3703_v21 = vpop.eup %3702 }
 0xff0   :  { %v1300_v22 = vmul.f32 %v3703_v21, %v1284_v58  ;;  %v1315_v23 = vadd.f32 %v3077_v19, %v1307_v20  ;;  %v1571_v20 = vld [vmem:[%s4374_s8 + $0x8] sm:$0xff] }
 0xff2   :  { %v1308_v24 = vmul.f32 %v3076_v16, %v1300_v22  ;;  %3356 = vmatprep.mubr.msk.f32.mxu0 %vm362_vm5, %v1315_v23  ;;  %v1572_v22 = vld [vmem:[%s4374_s8 + $0x10] sm:$0xff] }
 0xff4   :  { %v1316_v25 = vadd.f32 %v3077_v19, %v1308_v24  ;;  %v1570_v19 = vld [vmem:[%s4374_s8] sm:$0xff] }
 0xff5   :  { %v3575_v21 = vpack.c.bf16 %v1571_v20, %v1570_v19 }
 0xff6   :  { %3357 = vmatmul.mubr.msk.f32.vlgmr.msra.gmra.mrb[4].mxu0 %vm362_vm5, %v1316_v25 }
 0xff7   :  { %3576 = vmatprep.subr.bf16.mxu0 %v3575_v21 }
 0xff8   :  { %3578 = vmatpush3.bf16.msra.mxu0 %v3575_v21 }
0x10c9   :  { %v3358_v39 = vpop.f32.mrb[4].mxu0 }
0x10ca   :  { %v1406_v40 = vadd.f32 %v3358_v39, %v3078_v38  ;;  %v1400_v41 = vpop.f32.mrb[5].mxu0 }
0x10cb   :  { %v1401_v18 = vadd.f32 %v3078_v38, %v1400_v41  ;;  %v3086_v41 = vld [vmem:[%s4377_s24] ss:$0 sm:$0xff] }
0x10cc   :  { %v1412_v42 = vmul.f32 0.044715, %v1406_v40  ;;  %v1410_v57 = vmul.f32 0.5, %v1406_v40 }
0x10cd   :  { %v1411_v43 = vmul.f32 0.044715, %v1401_v18  ;;  %v1409_v55 = vmul.f32 0.5, %v1401_v18 }
0x10ce   :  { %v1414_v44 = vmul.f32 %v1412_v42, %v1406_v40 }
0x10cf   :  { %v1413_v45 = vmul.f32 %v1411_v43, %v1401_v18 }
0x10d0   :  { %v1416_v46 = vmul.f32 %v1414_v44, %v1406_v40 }
0x10d1   :  { %v1415_v47 = vmul.f32 %v1413_v45, %v1401_v18 }
0x10d2   :  { %v1418_v48 = vadd.f32 %v1416_v46, %v1406_v40 }
0x10d3   :  { %v1417_v49 = vadd.f32 %v1415_v47, %v1401_v18 }
0x10d4   :  { %v1420_v50 = vmul.f32 0.7978846, %v1418_v48 }
0x10d5   :  { %v1419_v51 = vmul.f32 0.7978846, %v1417_v49 }
0x10d6   :  { %3704 = vtanh.f32 %v1420_v50 }
0x10d7   :  { %3706 = vtanh.f32 %v1419_v51 }
0x10e0   :  { %v3705_v52 = vpop.eup %3704 }
0x10e1   :  { %v3707_v53 = vpop.eup %3706  ;;  %v1424_v54 = vadd.f32 1.0, %v3705_v52 }
0x10e2   :  { %v1423_v56 = vadd.f32 1.0, %v3707_v53 }
0x10e3   :  { %v1426_v59 = vmul.f32 %v1424_v54, %v1410_v57 }
0x10e4   :  { %v1425_v58 = vmul.f32 %v1423_v56, %v1409_v55 }
0x10e6   :  { %3375 = vmatprep.mubr.msk.f32.mxu1 %vm1442_vm8, %v1425_v58 }
0x10e7   :  { %3376 = vmatmul.mubr.msk.f32.vlgmr.msra.gmra.mrb[18].mxu1 %vm1442_vm8, %v1426_v59 }
0x10e8   :  { %3401 = vmatprep.mubr.msk.f32.mxu1 %vm3808_vm6, %v3806_v14 }
0x11ba   :  { %v3377_v15 = vpop.f32.mrb[18].mxu1 }
0x11bb   :  { %v1521_v12 = vadd.f32 %v3377_v15, %v3081_v60  ;;  %v1515_v61 = vpop.f32.mrb[19].mxu1 }
0x11bc   :  { %v1516_v63 = vadd.f32 %v3081_v60, %v1515_v61 }
0x11bd   :  { %v1525_v0 = vadd.f32 %v1521_v12, %v1316_v25 }
0x11be   :  { %v1524_v1 = vadd.f32 %v1516_v63, %v1315_v23  ;;  %v1573_v23 = vld [vmem:[%s4374_s8 + $0x18] sm:$0xff] }
0x11bf   :  { %v1531_v2 = vsel %vm362_vm5, %v1525_v0, 0.0  ;;  %v3579_v24 = vpack.c.bf16 %v1573_v23, %v1572_v22 }
0x11c0   :  { %1532 = vadd.xlane.f32.xlu0 %v1531_v2  ;;  %v1528_v3 = vsel %vm362_vm5, %v1524_v1, 0.0 }
0x11c1   :  { %1529 = vadd.xlane.f32.xlu1 %v1528_v3  ;;  %3580 = vmatprep.subr.bf16.mxu0 %v3579_v24 }
0x11c2   :  { %3582 = vmatpush3.bf16.msra.mxu0 %v3579_v24 }
0x11c3   :  { %3389 = vmatprep.subr.mxu0 %v3806_v14 }
0x124d   :  { %v1533_v4 = vpop.xlane.xlu0 %1532 }
0x124e   :  { %v1535_v5 = vmul.f32 0.03125, %v1533_v4  ;;  %v1530_v6 = vpop.xlane.xlu1 %1529 }
0x124f   :  { %v1534_v7 = vmul.f32 0.03125, %v1530_v6 }
0x1250   :  { %v1537_v8 = vsub.f32 %v1525_v0, %v1535_v5 }
0x1251   :  { %v1536_v9 = vsub.f32 %v1524_v1, %v1534_v7 }
0x1252   :  { %v1539_v10 = vmul.f32 %v1537_v8, %v1537_v8 }
0x1253   :  { %v1538_v13 = vmul.f32 %v1536_v9, %v1536_v9 }
0x1254   :  { %v1543_v16 = vsel %vm362_vm5, %v1539_v10, 0.0 }
0x1255   :  { %1544 = vadd.xlane.f32.xlu0 %v1543_v16  ;;  %v1540_v17 = vsel %vm362_vm5, %v1538_v13, 0.0 }
0x1256   :  { %1541 = vadd.xlane.f32.xlu1 %v1540_v17 }
0x12e2   :  { %v1545_v25 = vpop.xlane.xlu0 %1544 }
0x12e3   :  { %v1547_v26 = vmul.f32 0.03125, %v1545_v25  ;;  %v1542_v27 = vpop.xlane.xlu1 %1541 }
0x12e4   :  { %v1546_v29 = vmul.f32 0.03125, %v1542_v27 }
0x12e5   :  { %v1549_v30 = vadd.f32 1e-12, %v1547_v26 }
0x12e6   :  { %v1548_v31 = vadd.f32 1e-12, %v1546_v29 }
0x12e7   :  { %3708 = vrsqrt.f32 %v1549_v30 }
0x12e8   :  { %3710 = vrsqrt.f32 %v1548_v31 }
0x12f1   :  { %v3709_v32 = vpop.eup %3708 }
0x12f2   :  { %v3711_v34 = vpop.eup %3710  ;;  %v1553_v35 = vmul.f32 %v3709_v32, %v1537_v8 }
0x12f3   :  { %v1552_v11 = vmul.f32 %v3711_v34, %v1536_v9 }
0x12f4   :  { %v1561_v37 = vmul.f32 %v3084_v33, %v1553_v35 }
0x12f5   :  { %v1560_v38 = vmul.f32 %v3084_v33, %v1552_v11 }
0x12f6   :  { %v4194_v40 = vadd.f32 %v3085_v36, %v1561_v37 }
0x12f7   :  { %v4192_v39 = vadd.f32 %v3085_v36, %v1560_v38 }
0x12f9   :  { %3386 = vmatprep.mubr.msk.f32.mxu0 %vm362_vm5, %v4192_v39 }
0x12fa   :  { %3387 = vmatmul.mubr.msk.f32.vlgmr.msra.gmra.mrb[6].mxu0 %vm362_vm5, %v4194_v40 }
0x12fb   :  { %3391 = vmatprep.mubr.msk.f32.mxu0 %vm3808_vm6, %v3806_v14 }
0x13cd   :  { %v3388_v18 = vpop.f32.mrb[6].mxu0 }
0x13ce   :  { %v1653_v42 = vpop.f32.mrb[7].mxu0  ;;  %v4209_v44 = vadd.f32 %v3388_v18, %v3086_v41 }
0x13cf   :  { %v4203_v43 = vadd.f32 %v3086_v41, %v1653_v42  ;;  %v2330_v42 = vld [vmem:[%s4378_s30] sm:$0xff] }
0x13d1   :  { %1828 = vrot.lane.b32.xlu0 %v4203_v43, %s3810_s5  ;;  %1663 = vrot.lane.b32.xlu1 %v4203_v43, %s3809_s0 }
0x13d5   :  { %2162 = vrot.lane.b32.xlu0 %v4209_v44, %s3810_s5  ;;  %1826 = vrot.lane.b32.xlu1 %v4203_v43, %s3811_s9 }
0x13d9   :  { %1997 = vrot.lane.b32.xlu1 %v4209_v44, %s3809_s0 }
0x13dd   :  { %2160 = vrot.lane.b32.xlu1 %v4209_v44, %s3811_s9 }
0x1443   :  { %v1829_v45 = vpop.permute.xlu0 %1828  ;;  %v1664_v46 = vpop.permute.xlu1 %1663 }
0x1444   :  { %3390 = vmatpush3.xpose.msk.msra.mxu0 %vm203_vm0, %v1664_v46  ;;  %3400 = vmatpush3.xpose.msk.msra.mxu1 %vm203_vm0, %v1829_v45  ;;  %v2332_v45 = vld [vmem:[%s4378_s30 + $0x10] sm:$0xff]  ;;  %v2333_v46 = vld [vmem:[%s4378_s30 + $0x18] sm:$0xff] }
0x1445   :  { %3409 = vmatprep.subr.mxu1 %v3806_v14  ;;  %3394 = vmatprep.subr.mxu0 %v3806_v14 }
0x1447   :  { %3392 = vmatmul.mubr.msk.f32.vlgmr.msra.gmra.mrb[8].mxu0 %vm203_vm0, %v4203_v43  ;;  %v1827_v47 = vpop.permute.xlu1 %1826  ;;  %v2163_v49 = vpop.permute.xlu0 %2162 }
0x1448   :  { %3402 = vmatmul.mubr.msk.f32.vlgmr.msra.gmra.mrb[20].mxu1 %vm203_vm0, %v1827_v47  ;;  %3396 = vmatprep.mubr.msk.f32.mxu0 %vm3808_vm6, %v3806_v14  ;;  %v3587_v47 = vpack.c.bf16 %v2333_v46, %v2332_v45  ;;  %v2583_v45 = vld [vmem:[%s4383_s15 + $0x28] sm:$0xff] }
0x1449   :  { %3411 = vmatprep.mubr.msk.f32.mxu1 %vm3808_vm6, %v3806_v14 }
0x144b   :  { %v1998_v48 = vpop.permute.xlu1 %1997 }
0x144c   :  { %3410 = vmatpush3.xpose.msk.msra.mxu1 %vm203_vm0, %v1998_v48 }
0x144d   :  { %3419 = vmatprep.subr.mxu1 %v3806_v14 }
0x144f   :  { %3412 = vmatmul.mubr.msk.f32.vlgmr.msra.gmra.mrb[22].mxu1 %vm203_vm0, %v4209_v44  ;;  %v2161_v50 = vpop.permute.xlu1 %2160 }
0x1450   :  { %3420 = vmatpush3.xpose.msk.msra.mxu1 %vm203_vm0, %v2163_v49  ;;  %3421 = vmatprep.mubr.msk.f32.mxu1 %vm3808_vm6, %v3806_v14 }
0x1453   :  { %3422 = vmatmul.mubr.msk.f32.vlgmr.msra.gmra.mrb[24].mxu1 %vm203_vm0, %v2161_v50 }
0x151a   :  { %v1735_v51 = vpop.f32.mrb[8].mxu0 }
0x151b   :  { %v1736_v52 = vadd.f32 %v1735_v51, %v4082_v28  ;;  %v3393_v53 = vpop.f32.mrb[9].mxu0  ;;  %v1900_v54 = vpop.f32.mrb[20].mxu1 }
0x151c   :  { %v1901_v55 = vadd.f32 %v1900_v54, %v4082_v28  ;;  %v3403_v56 = vpop.f32.mrb[21].mxu1 }
0x151d   :  { %v1739_v57 = vsel %vm583_vm7, %v1736_v52, -inf }
0x151e   :  { %1740 = vmax.xlane.f32.xlu0 %v1739_v57  ;;  %v1904_v58 = vsel %vm583_vm7, %v1901_v55, -inf }
0x151f   :  { %1905 = vmax.xlane.f32.xlu1 %v1904_v58 }
0x1522   :  { %v2069_v59 = vpop.f32.mrb[22].mxu1 }
0x1523   :  { %v2070_v60 = vadd.f32 %v2069_v59, %v4117_v62  ;;  %v3413_v15 = vpop.f32.mrb[23].mxu1 }
0x1525   :  { %v2073_v12 = vsel %vm583_vm7, %v2070_v60, -inf }
0x1526   :  { %2074 = vmax.xlane.f32.xlu0 %v2073_v12  ;;  %v2234_v61 = vpop.f32.mrb[24].mxu1 }
0x1527   :  { %v2235_v63 = vadd.f32 %v2234_v61, %v4117_v62  ;;  %v3423_v0 = vpop.f32.mrb[25].mxu1 }
0x1529   :  { %v2238_v28 = vsel %vm583_vm7, %v2235_v63, -inf }
0x152a   :  { %2239 = vmax.xlane.f32.xlu0 %v2238_v28 }
0x1530   :  { %1750 = vrot.lane.b32.xlu1 %v4203_v43, %s3812_s13 }
0x15ab   :  { %v1741_v1 = vpop.xlane.xlu0 %1740 }
0x15ac   :  { %v1742_v2 = vsub.f32 %v1736_v52, %v1741_v1  ;;  %v1906_v3 = vpop.xlane.xlu1 %1905 }
0x15ad   :  { %v1907_v4 = vsub.f32 %v1901_v55, %v1906_v3 }
0x15ae   :  { %v1743_v5 = vmul.f32 1.442695, %v1742_v2 }
0x15af   :  { %v1908_v6 = vmul.f32 1.442695, %v1907_v4 }
0x15b0   :  { %3712 = vpow2.f32 %v1743_v5  ;;  %v1751_v7 = vpop.permute.xlu1 %1750 }
0x15b1   :  { %3714 = vpow2.f32 %v1908_v6  ;;  %3395 = vmatpush3.msra.mxu0 %v1751_v7 }
0x15b2   :  { %3404 = vmatprep.subr.mxu0 %v3806_v14 }
0x15b3   :  { %v2075_v62 = vpop.xlane.xlu0 %2074 }
0x15b4   :  { %v2076_v8 = vsub.f32 %v2070_v60, %v2075_v62  ;;  %v3101_v60 = vld [vmem:[%s4379_s6] ss:$0 sm:$0xff] }
0x15b6   :  { %v2077_v9 = vmul.f32 1.442695, %v2076_v8 }
0x15b7   :  { %v2240_v10 = vpop.xlane.xlu0 %2239 }
0x15b8   :  { %3716 = vpow2.f32 %v2077_v9  ;;  %v2241_v13 = vsub.f32 %v2235_v63, %v2240_v10  ;;  %v2468_v10 = vld [vmem:[%s4380_s7] sm:$0xff] }
0x15ba   :  { %v3713_v16 = vpop.eup %3712  ;;  %v2242_v17 = vmul.f32 1.442695, %v2241_v13  ;;  %v2469_v13 = vld [vmem:[%s4380_s7 + $0x8] sm:$0xff] }
0x15bb   :  { %v3715_v19 = vpop.eup %3714  ;;  %v1745_v20 = vsel %vm583_vm7, %v3713_v16, 0.0 }
0x15bc   :  { %3718 = vpow2.f32 %v2242_v17  ;;  %1746 = vadd.xlane.f32.xlu1 %v1745_v20  ;;  %v1910_v21 = vsel %vm583_vm7, %v3715_v19, 0.0  ;;  %v2470_v17 = vld [vmem:[%s4380_s7 + $0x10] sm:$0xff] }
0x15bd   :  { %1911 = vadd.xlane.f32.xlu0 %v1910_v21 }
0x15c2   :  { %v3717_v22 = vpop.eup %3716 }
0x15c3   :  { %v2079_v23 = vsel %vm583_vm7, %v3717_v22, 0.0 }
0x15c4   :  { %2080 = vadd.xlane.f32.xlu1 %v2079_v23 }
0x15c6   :  { %v3719_v24 = vpop.eup %3718 }
0x15c7   :  { %v2244_v25 = vsel %vm583_vm7, %v3719_v24, 0.0 }
0x15c8   :  { %2245 = vadd.xlane.f32.xlu0 %v2244_v25 }
0x15d5   :  { %2084 = vrot.lane.b32.xlu1 %v4209_v44, %s3812_s13 }
0x15d9   :  { %2249 = vrot.lane.b32.xlu1 %v4209_v44, %s3813_s17 }
0x15de   :  { %1915 = vrot.lane.b32.xlu0 %v4203_v43, %s3813_s17  ;;  %v2331_v43 = vld [vmem:[%s4378_s30 + $0x8] sm:$0xff] }
0x15df   :  { %v3583_v44 = vpack.c.bf16 %v2331_v43, %v2330_v42  ;;  %v2581_v42 = vld [vmem:[%s4383_s15 + $0x18] sm:$0xff] }
0x15e1   :  { %3584 = vmatprep.subr.bf16.mxu1 %v3583_v44 }
0x15e2   :  { %3586 = vmatpush3.bf16.msra.mxu1 %v3583_v44  ;;  %v2582_v44 = vld [vmem:[%s4383_s15 + $0x20] sm:$0xff] }
0x15e3   :  { %3588 = vmatprep.subr.bf16.mxu1 %v3587_v47  ;;  %v3607_v46 = vpack.c.bf16 %v2583_v45, %v2582_v44 }
0x15e6   :  { %3590 = vmatpush3.bf16.msra.mxu1 %v3587_v47  ;;  %v2584_v47 = vld [vmem:[%s4383_s15 + $0x30] sm:$0xff] }
0x1649   :  { %v1747_v26 = vpop.xlane.xlu1 %1746 }
0x164a   :  { %3720 = vrcp.f32 %v1747_v26  ;;  %v1912_v27 = vpop.xlane.xlu0 %1911 }
0x164b   :  { %3722 = vrcp.f32 %v1912_v27 }
0x1651   :  { %v2081_v29 = vpop.xlane.xlu1 %2080 }
0x1652   :  { %3724 = vrcp.f32 %v2081_v29  ;;  %v3104_v29 = vld [vmem:[%s4381_s10] ss:$0 sm:$0xff] }
0x1654   :  { %v3721_v30 = vpop.eup %3720 }
0x1655   :  { %v1749_v31 = vmul.f32 %v3721_v30, %v3713_v16  ;;  %v2246_v32 = vpop.xlane.xlu0 %2245  ;;  %v3723_v33 = vpop.eup %3722  ;;  %v3591_v16 = vpack.c.bf16 %v2469_v13, %v2468_v10 }
0x1656   :  { %3726 = vrcp.f32 %v2246_v32  ;;  %v1914_v34 = vmul.f32 %v3723_v33, %v3715_v19  ;;  %v2085_v35 = vpop.permute.xlu1 %2084  ;;  %v2471_v19 = vld [vmem:[%s4380_s7 + $0x18] sm:$0xff] }
0x1657   :  { %3397 = vmatmul.mubr.msk.f32.vlgmr.msra.gmra.mrb[10].mxu0 %vm583_vm7, %v1749_v31  ;;  %v3595_v20 = vpack.c.bf16 %v2471_v19, %v2470_v17  ;;  %v3105_v31 = vld [vmem:[%s4382_s11] ss:$0 sm:$0xff] }
0x1658   :  { %3406 = vmatprep.mubr.msk.f32.mxu0 %vm3808_vm6, %v3806_v14 }
0x1659   :  { %v1916_v11 = vpop.permute.xlu0 %1915 }
0x165a   :  { %3405 = vmatpush3.msra.mxu0 %v1916_v11  ;;  %v2250_v38 = vpop.permute.xlu1 %2249 }
0x165b   :  { %3407 = vmatmul.mubr.msk.f32.vlgmr.msra.gmra.mrb[12].mxu0 %vm583_vm7, %v1914_v34  ;;  %3414 = vmatprep.subr.mxu0 %v3806_v14 }
0x165c   :  { %v3725_v36 = vpop.eup %3724  ;;  %3415 = vmatpush3.msra.mxu0 %v2085_v35  ;;  %3416 = vmatprep.mubr.msk.f32.mxu0 %vm3808_vm6, %v3806_v14 }
0x165d   :  { %v2083_v37 = vmul.f32 %v3725_v36, %v3717_v22  ;;  %3424 = vmatprep.subr.mxu0 %v3806_v14 }
0x165f   :  { %3417 = vmatmul.mubr.msk.f32.vlgmr.msra.gmra.mrb[14].mxu0 %vm583_vm7, %v2083_v37  ;;  %v2578_v37 = vld [vmem:[%s4383_s15] sm:$0xff] }
0x1660   :  { %v3727_v41 = vpop.eup %3726  ;;  %3425 = vmatpush3.msra.mxu0 %v2250_v38  ;;  %3426 = vmatprep.mubr.msk.f32.mxu0 %vm3808_vm6, %v3806_v14  ;;  %v2579_v38 = vld [vmem:[%s4383_s15 + $0x8] sm:$0xff] }
0x1661   :  { %v2248_v18 = vmul.f32 %v3727_v41, %v3719_v24  ;;  %3592 = vmatprep.subr.bf16.mxu0 %v3591_v16  ;;  %v3599_v41 = vpack.c.bf16 %v2579_v38, %v2578_v37 }
0x1663   :  { %3427 = vmatmul.mubr.msk.f32.vlgmr.msra.gmra.mrb[16].mxu0 %vm583_vm7, %v2248_v18  ;;  %v2580_v18 = vld [vmem:[%s4383_s15 + $0x10] sm:$0xff]  ;;  %3600 = vmatprep.subr.bf16.mxu1 %v3599_v41 }
0x1664   :  { %3594 = vmatpush3.bf16.msra.mxu0 %v3591_v16  ;;  %v3603_v43 = vpack.c.bf16 %v2581_v42, %v2580_v18 }
0x1665   :  { %3596 = vmatprep.subr.bf16.mxu0 %v3595_v20 }
0x1668   :  { %3598 = vmatpush3.bf16.msra.mxu0 %v3595_v20 }
0x172a   :  { %v1822_v48 = vpop.f32.mrb[10].mxu0 }
0x172b   :  { %v3398_v49 = vpop.f32.mrb[11].mxu0 }
0x172e   :  { %v1987_v50 = vpop.f32.mrb[12].mxu0 }
0x172f   :  { %1992 = vrot.lane.b32.xlu0 %v1987_v50, %s3814_s21  ;;  %v3408_v51 = vpop.f32.mrb[13].mxu0  ;;  %v3106_v50 = vld [vmem:[%s4384_s16] ss:$0 sm:$0xff] }
0x1732   :  { %v2156_v52 = vpop.f32.mrb[14].mxu0 }
0x1733   :  { %v3418_v53 = vpop.f32.mrb[15].mxu0 }
0x1736   :  { %v2321_v54 = vpop.f32.mrb[16].mxu0 }
0x1737   :  { %2326 = vrot.lane.b32.xlu1 %v2321_v54, %s3814_s21  ;;  %v3428_v55 = vpop.f32.mrb[17].mxu0 }
0x17a1   :  { %v1993_v56 = vpop.permute.xlu0 %1992 }
0x17a2   :  { %v1995_v57 = vsel %vm203_vm0, %v1822_v48, %v1993_v56  ;;  %v2585_v48 = vld [vmem:[%s4383_s15 + $0x38] sm:$0xff] }
0x17a3   :  { %3437 = vmatprep.mubr.msk.f32.mxu1 %vm362_vm5, %v1995_v57  ;;  %v3611_v49 = vpack.c.bf16 %v2585_v48, %v2584_v47  ;;  %v3113_v47 = vld [vmem:[%s4388_s26] ss:$0 sm:$0xff] }
0x17a9   :  { %v2327_v58 = vpop.permute.xlu1 %2326 }
0x17aa   :  { %v2329_v59 = vsel %vm203_vm0, %v2156_v52, %v2327_v58 }
0x17ab   :  { %3438 = vmatmul.mubr.msk.f32.vlgmr.msra.gmra.mrb[26].mxu1 %vm362_vm5, %v2329_v59 }
0x17ac   :  { %3602 = vmatpush3.bf16.msra.mxu1 %v3599_v41 }
0x17ad   :  { %3604 = vmatprep.subr.bf16.mxu1 %v3603_v43 }
0x17b0   :  { %3606 = vmatpush3.bf16.msra.mxu1 %v3603_v43  ;;  %v3112_v43 = vld [vmem:[%s4387_s23] ss:$0 sm:$0xff] }
0x17b1   :  { %3608 = vmatprep.subr.bf16.mxu1 %v3607_v46 }
0x17b4   :  { %3610 = vmatpush3.bf16.msra.mxu1 %v3607_v46 }
0x17b5   :  { %3612 = vmatprep.subr.bf16.mxu1 %v3611_v49 }
0x17b8   :  { %3614 = vmatpush3.bf16.msra.mxu1 %v3611_v49 }
0x187e   :  { %v3439_v15 = vpop.f32.mrb[26].mxu1 }
0x187f   :  { %v2419_v12 = vadd.f32 %v3439_v15, %v3101_v60  ;;  %v2413_v61 = vpop.f32.mrb[27].mxu1 }
0x1880   :  { %v2414_v63 = vadd.f32 %v3101_v60, %v2413_v61 }
0x1881   :  { %v2423_v0 = vadd.f32 %v2419_v12, %v4194_v40 }
0x1882   :  { %v2422_v28 = vadd.f32 %v2414_v63, %v4192_v39 }
0x1883   :  { %v2429_v1 = vsel %vm362_vm5, %v2423_v0, 0.0 }
0x1884   :  { %2430 = vadd.xlane.f32.xlu1 %v2429_v1  ;;  %v2426_v2 = vsel %vm362_vm5, %v2422_v28, 0.0 }
0x1885   :  { %2427 = vadd.xlane.f32.xlu0 %v2426_v2 }
0x1911   :  { %v2431_v3 = vpop.xlane.xlu1 %2430 }
0x1912   :  { %v2433_v4 = vmul.f32 0.03125, %v2431_v3  ;;  %v2428_v5 = vpop.xlane.xlu0 %2427 }
0x1913   :  { %v2432_v6 = vmul.f32 0.03125, %v2428_v5 }
0x1914   :  { %v2435_v7 = vsub.f32 %v2423_v0, %v2433_v4 }
0x1915   :  { %v2434_v62 = vsub.f32 %v2422_v28, %v2432_v6 }
0x1916   :  { %v2437_v39 = vmul.f32 %v2435_v7, %v2435_v7 }
0x1917   :  { %v2436_v8 = vmul.f32 %v2434_v62, %v2434_v62 }
0x1918   :  { %v2441_v9 = vsel %vm362_vm5, %v2437_v39, 0.0 }
0x1919   :  { %v2438_v40 = vsel %vm362_vm5, %v2436_v8, 0.0 }
0x191a   :  { %2439 = vadd.xlane.f32.xlu0 %v2438_v40 }
0x191e   :  { %2442 = vadd.xlane.f32.xlu0 %v2441_v9 }
0x19a7   :  { %v2440_v21 = vpop.xlane.xlu0 %2439 }
0x19a8   :  { %v2444_v22 = vmul.f32 0.03125, %v2440_v21 }
0x19aa   :  { %v2446_v23 = vadd.f32 1e-12, %v2444_v22 }
0x19ab   :  { %v2443_v24 = vpop.xlane.xlu0 %2442 }
0x19ac   :  { %3728 = vrsqrt.f32 %v2446_v23  ;;  %v2445_v25 = vmul.f32 0.03125, %v2443_v24 }
0x19ae   :  { %v2447_v26 = vadd.f32 1e-12, %v2445_v25 }
0x19b0   :  { %3730 = vrsqrt.f32 %v2447_v26 }
0x19b6   :  { %v3729_v27 = vpop.eup %3728 }
0x19b7   :  { %v2450_v30 = vmul.f32 %v3729_v27, %v2434_v62 }
0x19b9   :  { %v2458_v32 = vmul.f32 %v3104_v29, %v2450_v30  ;;  %v2726_v30 = vld [vmem:[%s4386_s22 + $0x8] sm:$0xff] }
0x19ba   :  { %v3731_v33 = vpop.eup %3730 }
0x19bb   :  { %v2451_v34 = vmul.f32 %v3731_v33, %v2435_v7  ;;  %v2466_v35 = vadd.f32 %v3105_v31, %v2458_v32  ;;  %v3109_v7 = vld [vmem:[%s4385_s18] ss:$0 sm:$0xff]  ;;  %v2727_v32 = vld [vmem:[%s4386_s22 + $0x10] sm:$0xff]  ;;  %v2728_v33 = vld [vmem:[%s4386_s22 + $0x18] sm:$0xff] }
0x19bd   :  { %v2459_v11 = vmul.f32 %v3104_v29, %v2451_v34  ;;  %3448 = vmatprep.mubr.msk.f32.mxu0 %vm362_vm5, %v2466_v35  ;;  %v2725_v29 = vld [vmem:[%s4386_s22] sm:$0xff]  ;;  %v3815_v34 = vmov 0.0|0.0  }
0x19be   :  { %3615 = vmatprep.subr.bf16.mxu0 %v3815_v34  ;;  %3624 = vmatprep.subr.bf16.mxu1 %v3815_v34 }
0x19bf   :  { %v2467_v36 = vadd.f32 %v3105_v31, %v2459_v11  ;;  %v3616_v31 = vpack.c.bf16 %v2726_v30, %v2725_v29 }
0x19c1   :  { %3449 = vmatmul.mubr.msk.f32.vlgmr.msra.gmra.mrb[18].mxu0 %vm362_vm5, %v2467_v36 }
0x19c2   :  { %3478 = vmatprep.mubr.msk.f32.mxu0 %vm3808_vm6, %v3806_v14  ;;  %3617 = vmatpush3.bf16.msra.mxu0 %v3616_v31 }
0x19c3   :  { %3618 = vmatprep.subr.bf16.mxu0 %v3815_v34 }
0x1a94   :  { %v3450_v51 = vpop.f32.mrb[18].mxu0 }
0x1a95   :  { %v2557_v52 = vadd.f32 %v3450_v51, %v3106_v50  ;;  %v2551_v53 = vpop.f32.mrb[19].mxu0 }
0x1a96   :  { %v2552_v54 = vadd.f32 %v3106_v50, %v2551_v53 }
0x1a97   :  { %v2563_v55 = vmul.f32 0.044715, %v2557_v52  ;;  %v2561_v4 = vmul.f32 0.5, %v2557_v52 }
0x1a98   :  { %v2562_v56 = vmul.f32 0.044715, %v2552_v54  ;;  %v2560_v2 = vmul.f32 0.5, %v2552_v54 }
0x1a99   :  { %v2565_v57 = vmul.f32 %v2563_v55, %v2557_v52  ;;  %v2811_v55 = vld [vmem:[%s4389_s28 + $0x8] sm:$0xff] }
0x1a9a   :  { %v2564_v58 = vmul.f32 %v2562_v56, %v2552_v54 }
0x1a9b   :  { %v2567_v59 = vmul.f32 %v2565_v57, %v2557_v52  ;;  %v2812_v57 = vld [vmem:[%s4389_s28 + $0x10] sm:$0xff] }
0x1a9c   :  { %v2566_v60 = vmul.f32 %v2564_v58, %v2552_v54  ;;  %v3114_v58 = vld [vmem:[%s4390_s1] ss:$0 sm:$0xff] }
0x1a9d   :  { %v2569_v15 = vadd.f32 %v2567_v59, %v2557_v52 }
0x1a9e   :  { %v2568_v12 = vadd.f32 %v2566_v60, %v2552_v54  ;;  %v2810_v54 = vld [vmem:[%s4389_s28] sm:$0xff] }
0x1a9f   :  { %v2571_v61 = vmul.f32 0.7978846, %v2569_v15  ;;  %v3622_v56 = vpack.c.bf16 %v2811_v55, %v2810_v54 }
0x1aa0   :  { %v2570_v63 = vmul.f32 0.7978846, %v2568_v12 }
0x1aa1   :  { %3732 = vtanh.f32 %v2571_v61  ;;  %v2895_v61 = vld [vmem:[%s4000_s20] sm:$0xff] }
0x1aa2   :  { %3734 = vtanh.f32 %v2570_v63  ;;  %v2896_v63 = vld [vmem:[%s4000_s20 + $0x8] sm:$0xff] }
0x1aab   :  { %v3733_v0 = vpop.eup %3732 }
0x1aac   :  { %v3735_v28 = vpop.eup %3734  ;;  %v2575_v1 = vadd.f32 1.0, %v3733_v0  ;;  %v3625_v0 = vpack.c.bf16 %v2896_v63, %v2895_v61 }
0x1aad   :  { %v2574_v3 = vadd.f32 1.0, %v3735_v28  ;;  %v2897_v28 = vld [vmem:[%s4000_s20 + $0x10] sm:$0xf] }
0x1aae   :  { %v2577_v6 = vmul.f32 %v2575_v1, %v2561_v4  ;;  %v3116_v1 = vld [vmem:[%s3995_s12] ss:$0 sm:$0xff]  ;;  %s3816_s12 = smov [#allocation2]  }
0x1aaf   :  { %v2576_v5 = vmul.f32 %v2574_v3, %v2560_v2  ;;  %s3003_s20 = sshll.u32 %s3816_s12, 4  ;;  %s3004_s20 = int_to_ptr.vmem [resolvable:$true] %s3003_s20 }
0x1ab0   :  { %p3749_p1 = scmp.lt.s32.totalorder %s3004_s20, %s3004_s20 }
0x1ab1   :  { %3467 = vmatprep.mubr.msk.f32.mxu1 %vm1442_vm8, %v2576_v5 }
0x1ab2   :  { %3468 = vmatmul.mubr.msk.f32.vlgmr.msra.gmra.mrb[28].mxu1 %vm1442_vm8, %v2577_v6  ;;  %v3118_v6 = vld [vmem:[%s4005_s27] ss:$0 sm:$0xff]  ;;  %s3744_s27 = scalar_lea.vmem %s3004_s20, 32 }
0x1ab3   :  { %3496 = vmatprep.mubr.msk.f32.mxu1 %vm3808_vm6, %v3806_v14  ;;  %3626 = vmatpush3.bf16.msra.mxu1 %v3625_v0  ;;  %p3745_p0 = scmp.ne.s32.totalorder %s3004_s20, %s3744_s27  ;;  %p3750_p2 = scmp.lt.s32.totalorder %s3744_s27, %s3744_s27 }
0x1ab4   :  { %3494 = vmatprep.subr.mxu1 %v3806_v14 }
0x1ab5   :  { %p3751_p3 = por %p3750_p2, %p3749_p1 }
0x1ab7   :  { %3495 = vmatpush3.msk.msra.mxu1 %vm2909_vm11, %v2897_v28  ;;  %p3752_p4 = pnand %p3751_p3, %p3745_p0 }
0x1b85   :  { %v3469_v62 = vpop.f32.mrb[28].mxu1 }
0x1b86   :  { %v2671_v8 = vadd.f32 %v3469_v62, %v3109_v7  ;;  %v2665_v40 = vpop.f32.mrb[29].mxu1 }
0x1b87   :  { %v2666_v39 = vadd.f32 %v3109_v7, %v2665_v40 }
0x1b88   :  { %v2675_v9 = vadd.f32 %v2671_v8, %v2467_v36 }
0x1b89   :  { %v2674_v10 = vadd.f32 %v2666_v39, %v2466_v35  ;;  %v3619_v35 = vpack.c.bf16 %v2728_v33, %v2727_v32 }
0x1b8a   :  { %v2681_v13 = vsel %vm362_vm5, %v2675_v9, 0.0 }
0x1b8b   :  { %2682 = vadd.xlane.f32.xlu1 %v2681_v13  ;;  %v2678_v16 = vsel %vm362_vm5, %v2674_v10, 0.0  ;;  %3620 = vmatpush3.bf16.msra.mxu0 %v3619_v35 }
0x1b8c   :  { %2679 = vadd.xlane.f32.xlu0 %v2678_v16  ;;  %3621 = vmatprep.subr.bf16.mxu0 %v3815_v34 }
0x1c18   :  { %v2683_v17 = vpop.xlane.xlu1 %2682 }
0x1c19   :  { %v2685_v19 = vmul.f32 0.03125, %v2683_v17  ;;  %v2680_v20 = vpop.xlane.xlu0 %2679 }
0x1c1a   :  { %v2684_v21 = vmul.f32 0.03125, %v2680_v20 }
0x1c1b   :  { %v2687_v22 = vsub.f32 %v2675_v9, %v2685_v19 }
0x1c1c   :  { %v2686_v23 = vsub.f32 %v2674_v10, %v2684_v21 }
0x1c1d   :  { %v2689_v24 = vmul.f32 %v2687_v22, %v2687_v22 }
0x1c1e   :  { %v2688_v25 = vmul.f32 %v2686_v23, %v2686_v23 }
0x1c1f   :  { %v2693_v26 = vsel %vm362_vm5, %v2689_v24, 0.0 }
0x1c20   :  { %2694 = vadd.xlane.f32.xlu1 %v2693_v26  ;;  %v2690_v27 = vsel %vm362_vm5, %v2688_v25, 0.0 }
0x1c21   :  { %2691 = vadd.xlane.f32.xlu0 %v2690_v27 }
0x1cad   :  { %v2695_v11 = vpop.xlane.xlu1 %2694 }
0x1cae   :  { %v2697_v36 = vmul.f32 0.03125, %v2695_v11  ;;  %v2692_v37 = vpop.xlane.xlu0 %2691 }
0x1caf   :  { %v2696_v38 = vmul.f32 0.03125, %v2692_v37 }
0x1cb0   :  { %v2699_v41 = vadd.f32 1e-12, %v2697_v36 }
0x1cb1   :  { %v2698_v18 = vadd.f32 1e-12, %v2696_v38 }
0x1cb2   :  { %3736 = vrsqrt.f32 %v2699_v41 }
0x1cb3   :  { %3738 = vrsqrt.f32 %v2698_v18 }
0x1cbc   :  { %v3737_v42 = vpop.eup %3736 }
0x1cbd   :  { %v3739_v44 = vpop.eup %3738  ;;  %v2703_v45 = vmul.f32 %v3737_v42, %v2687_v22 }
0x1cbe   :  { %v2702_v46 = vmul.f32 %v3739_v44, %v2686_v23 }
0x1cbf   :  { %v2711_v48 = vmul.f32 %v3112_v43, %v2703_v45 }
0x1cc0   :  { %v2710_v49 = vmul.f32 %v3112_v43, %v2702_v46 }
0x1cc1   :  { %v2719_v50 = vadd.f32 %v3113_v47, %v2711_v48 }
0x1cc2   :  { %v2718_v51 = vadd.f32 %v3113_v47, %v2710_v49 }
0x1cc3   :  { %v2721_v52 = vrot.slane %v2719_v50, 7 }
0x1cc5   :  { %v2724_v53 = vsel %vm2723_vm9, %v2718_v51, %v2721_v52 }
0x1cc6   :  { %3479 = vmatmul.mubr.msk.f32.vlgmr.msra.gmra.mrb[20].mxu0 %vm362_vm5, %v2724_v53 }
0x1cc7   :  { %3487 = vmatprep.mubr.msk.f32.mxu0 %vm3808_vm6, %v3806_v14  ;;  %3623 = vmatpush3.bf16.msra.mxu0 %v3622_v56 }
0x1cc8   :  { %3485 = vmatprep.subr.mxu0 %v3806_v14 }
0x1ccb   :  { %3486 = vmatpush3.msra.mxu0 %v2812_v57 }
0x1d99   :  { %v2805_v59 = vpop.f32.mrb[20].mxu0 }
0x1d9a   :  { %v2806_v60 = vadd.f32 %v3114_v58, %v2805_v59  ;;  %v3480_v15 = vpop.f32.mrb[21].mxu0 }
0x1d9c   :  { %v2809_v12 = vmax.f32 %v2806_v60, 0.0 }
0x1d9e   :  { %3488 = vmatmul.mubr.msk.f32.vlgmr.msra.gmra.mrb[22].mxu0 %vm2820_vm10, %v2809_v12 }
0x1e71   :  { %v2890_v2 = vpop.f32.mrb[22].mxu0 }
0x1e72   :  { %v2891_v3 = vadd.f32 %v3116_v1, %v2890_v2  ;;  %v3489_v4 = vpop.f32.mrb[23].mxu0 }
0x1e74   :  { %v2894_v5 = vmax.f32 %v2891_v3, 0.0 }
0x1e76   :  { %3497 = vmatmul.mubr.msk.f32.vlgmr.msra.gmra.mrb[30].mxu1 %vm2905_vm12, %v2894_v5 }
0x1f49   :  { %v2979_v7 = vpop.f32.mrb[30].mxu1 }
0x1f4a   :  { %v2980_v62 = vadd.f32 %v3118_v6, %v2979_v7  ;;  %v3498_v8 = vpop.f32.mrb[31].mxu1 }
0x1f4c   :  { %v2984_v40 = vsel %vm2983_vm13, %v2980_v62, -inf }
0x1f4d   :  { %2985 = vmax.xlane.f32.xlu1 %v2984_v40 }
0x1fda   :  { %v2986_v39 = vpop.xlane.xlu1 %2985 }
0x1fdb   :  { %v2987_v14 = vsub.f32 %v2980_v62, %v2986_v39 }
0x1fdd   :  { %v2988_v9 = vmul.f32 1.442695, %v2987_v14 }
0x1fdf   :  { %3740 = vpow2.f32 %v2988_v9 }
0x1fe9   :  { %v3741_v10 = vpop.eup %3740 }
0x1fea   :  { %v2990_v13 = vsel %vm2983_vm13, %v3741_v10, 0.0 }
0x1feb   :  { %2991 = vadd.xlane.f32.xlu0 %v2990_v13 }
0x2078   :  { %v2992_v16 = vpop.xlane.xlu0 %2991 }
0x2079   :  { %3742 = vlog2.f32 %v2992_v16 }
0x2083   :  { %v3743_v17 = vpop.eup %3742 }
0x2084   :  { %v2994_v19 = vmul.f32 0.6931472, %v3743_v17 }
0x2086   :  { %v2995_v20 = vsub.f32 %v2987_v14, %v2994_v19 }
0x2088   :  { %2996 = vst.msk [vmem:[#allocation2] sm:$0x3] %vm2983_vm13, %v2995_v20 }
0x2089   :  { %3755 = shalt.err (!%p3752_p4)
}
0x208a   :  { %s3756_s2 = scalar_lea.hbm %s4010_s4, 32 }
0x208b   :  { %p3757_p5 = scmp.ne.s32.totalorder %s4010_s4, %s3756_s2  ;;  %p3760_p6 = scmp.lt.u32.totalorder %s3756_s2, %s4010_s4 }
0x208d   :  { %p3762_p7 = pnand %p3760_p6, %p3757_p5 }
0x208f   :  { %3765 = shalt.err (!%p3762_p7)
}
0x2090   :  { %3006 = dma.vmem_to_hbm [thread:$0]  %s3004_s20, 32, %s4010_s4, [#allocation3]  }
0x2091   :  { %3766 = dma.done.wait [#allocation3], 32  }
0x2092   :  { %3767 = vsyncadd [#allocation3], 4294967264 }
0x2093   :  { %3010 = vsyncpa [#allocation3], 1 }

</bundles_post_ra>
